<compile_context>
chip_gen: v7x
topology: tpu7x:2x2x1
jax: 0.10.0
libtpu: 0.0.40
codegen_flags: <defaults>
</compile_context>

<pallas_src>
import jax
import jax.numpy as jnp
from jax.experimental import pallas as pl
from jax.experimental.pallas import tpu as pltpu

# ----- sizes -----------------------------------------------------------------
B = 2        # batch
N_OBS = 8    # 2n observation points
N_SUP = 8    # 2n support points
M = 8        # query points
P = 3        # point dim
H = 32       # hidden dim of feature-field MLP
F = 16       # feature dim
SIGMA = 0.5  # RBF lengthscale
LAM = 1e-2   # ridge regularization
_INV_2SIG2 = 0.5 / (SIGMA * SIGMA)


# ----- in-kernel helpers ------------------------------------------------------
def _pair_sqdist(a, b):
    """||a_i - b_j||^2 as [Na, Nb]. Transposes are absorbed into dot_general contractions
    (((1,),(1,)),((),())) so no XLU transpose / .T broadcast is emitted."""
    aa = jnp.sum(a * a, axis=-1, keepdims=True)                                # [Na, 1]
    ones = jnp.ones((1, b.shape[-1]), jnp.float32)
    bb = jax.lax.dot_general(ones, b * b, (((1,), (1,)), ((), ())),
                             preferred_element_type=jnp.float32)               # [1, Nb]
    ab = jax.lax.dot_general(a, b, (((1,), (1,)), ((), ())),
                             preferred_element_type=jnp.float32)               # [Na, Nb]
    return aa + bb - 2.0 * ab


def _gauss_jordan_solve(a, rhs):
    """Solve a @ x = rhs for SPD `a` (K + ridge => diagonally dominant enough; no pivoting).
    Fully unrolled (n is a small compile-time constant) and vectorized via masks/reductions,
    so it stays on the VPU/XLU and keeps alpha resident in VMEM."""
    n, r = a.shape[0], rhs.shape[1]
    row_nn = jax.lax.broadcasted_iota(jnp.int32, (n, n), 0)
    col_nn = jax.lax.broadcasted_iota(jnp.int32, (n, n), 1)
    lane_1n = jax.lax.broadcasted_iota(jnp.int32, (1, n), 1)
    row_n1 = jax.lax.broadcasted_iota(jnp.int32, (n, 1), 0)
    row_nr = jax.lax.broadcasted_iota(jnp.int32, (n, r), 0)
    for k in range(n):  # static unroll
        row_k = jnp.sum(jnp.where(row_nn == k, a, 0.0), axis=0, keepdims=True)      # [1, n]
        rhs_k = jnp.sum(jnp.where(row_nr == k, rhs, 0.0), axis=0, keepdims=True)    # [1, r]
        pivot = jnp.sum(jnp.where(lane_1n == k, row_k, 0.0), axis=1, keepdims=True)  # [1, 1]
        inv_p = 1.0 / pivot                                   # exact divide (solve accuracy)
        row_kn = row_k * inv_p
        rhs_kn = rhs_k * inv_p
        col_k = jnp.sum(jnp.where(col_nn == k, a, 0.0), axis=1, keepdims=True)      # [n, 1]
        is_k = row_n1 == k                                                          # [n, 1]
        factor = jnp.where(is_k, 0.0, col_k)                                        # [n, 1]
        a = jnp.where(is_k, row_kn, a - factor * row_kn)
        rhs = jnp.where(is_k, rhs_kn, rhs - factor * rhs_kn)
    return rhs                                                                       # [n, r]


# ----- fused kernel body ------------------------------------------------------
def _nkf_kernel(obs_in_ref, sup_pts_ref, sup_lbl_ref, q_pts_ref,
                w1_ref, b1_ref, we1p_ref, we1c_ref, be1_ref, we2_ref, be2_ref,
                wwf_ref, wwp_ref, bw_ref,
                out_ref,
                codeb_vmem, sfeat_vmem, alpha_vmem):
    # ---------------- fit (Eq. 9): once per batch element, at the first query tile --------
    @pl.when(pl.program_id(1) == 0)
    def _fit():
        obs_in = obs_in_ref[0]                                   # [N_OBS, P+1]
        sup_pts = sup_pts_ref[0]                                 # [N_SUP, P]
        sup_lbl = sup_lbl_ref[0]                                 # [N_SUP, 1]

        # feature_field.encode: pointwise MLP over [points, labels] + mean-pool
        h = jnp.maximum(
            jnp.dot(obs_in, w1_ref[...], preferred_element_type=jnp.float32)
            + b1_ref[...], 0.0)                                  # [N_OBS, H]
        code = jnp.mean(h, axis=0, keepdims=True)                # [1, H]
        # fold the latent-code contribution of evaluate()'s first layer into one bias
        code_bias = (jnp.dot(code, we1c_ref[...], preferred_element_type=jnp.float32)
                     + be1_ref[...])                             # [1, H]
        codeb_vmem[...] = code_bias

        # feature_field.evaluate(support_points)
        hs = jnp.maximum(
            jnp.dot(sup_pts, we1p_ref[...], preferred_element_type=jnp.float32)
            + code_bias, 0.0)
        sfeat = (jnp.dot(hs, we2_ref[...], preferred_element_type=jnp.float32)
                 + be2_ref[...])                                 # [N_SUP, F]
        sfeat_vmem[...] = sfeat

        # weight_model(support_points, support_features)
        w = jax.nn.sigmoid(
            jnp.dot(sfeat, wwf_ref[...], preferred_element_type=jnp.float32)
            + jnp.dot(sup_pts, wwp_ref[...], preferred_element_type=jnp.float32)
            + bw_ref[...])                                       # [N_SUP, 1]
        w = jnp.maximum(w, 1e-6)                                 # keep the ridge finite

        # K(X, X), X = [support_features, support_points] ('concat' input_type)
        d2 = _pair_sqdist(sfeat, sfeat) + _pair_sqdist(sup_pts, sup_pts)
        k_mat = jnp.exp(-jnp.maximum(d2, 0.0) * _INV_2SIG2)      # [N_SUP, N_SUP]

        n = k_mat.shape[0]
        row = jax.lax.broadcasted_iota(jnp.int32, (n, n), 0)
        col = jax.lax.broadcasted_iota(jnp.int32, (n, n), 1)
        eye = (row == col).astype(jnp.float32)
        a_mat = k_mat + (LAM * eye) * pl.reciprocal(w, approx=True)   # weighted ridge

        # in-kernel solve of the SPD system -> alpha stays in VMEM
        alpha_vmem[...] = _gauss_jordan_solve(a_mat, sup_lbl)    # [N_SUP, 1]

    # ---------------- predict (Eq. 10): every (batch, query-tile) step ---------------------
    q_pts = q_pts_ref[0]                                         # [TQ, P]
    code_bias = codeb_vmem[...]
    hq = jnp.maximum(
        jnp.dot(q_pts, we1p_ref[...], preferred_element_type=jnp.float32)
        + code_bias, 0.0)
    qfeat = (jnp.dot(hq, we2_ref[...], preferred_element_type=jnp.float32)
             + be2_ref[...])                                     # [TQ, F]

    sfeat = sfeat_vmem[...]
    sup_pts = sup_pts_ref[0]
    d2q = _pair_sqdist(sfeat, qfeat) + _pair_sqdist(sup_pts, q_pts)   # [N_SUP, TQ]
    kq = jnp.exp(-jnp.maximum(d2q, 0.0) * _INV_2SIG2)            # K(support, query), symmetric RBF
    # lane-dense store: out[1, TQ] = sum_i alpha_i * K(x_i, q_j)
    out_ref[0] = jnp.sum(kq * alpha_vmem[...], axis=0, keepdims=True)


# ----- wrapper (single fused pallas_call) ------------------------------------
def neural_kernel_field_forward(observations, query_points, params, chunk_size=-1):
    """Mirrors NeuralKernelField.forward: fit(observations) then predict(query_points)."""
    obs_pts, obs_lbl, sup_pts, sup_lbl = observations
    b, m, p_dim = query_points.shape
    n_obs = obs_pts.shape[1]
    n_sup = sup_pts.shape[1]
    h_dim = params["b1"].shape[-1]
    f_dim = params["be2"].shape[-1]

    # merge the split encode matmul by pre-concatenating weights / inputs in the wrapper
    obs_in = jnp.concatenate([obs_pts, obs_lbl], axis=-1)              # [B, N_OBS, P+1]
    w1 = jnp.concatenate([params["w1p"], params["w1l"]], axis=0)       # [P+1, H]

    # chunking becomes a second grid axis (one launch, pipelined query tiles).
    # TODO(synk): chunk sizes that violate the TPU (8,128) block constraint fall back to a
    # single fused query tile (results are identical; chunking only changes scheduling).
    if chunk_size > 0 and m % chunk_size == 0 and (chunk_size % 128 == 0 or chunk_size == m):
        tq = chunk_size
    else:
        tq = m
    n_q = m // tq

    out = pl.pallas_call(
        _nkf_kernel,
        out_shape=jax.ShapeDtypeStruct((b, 1, m), jnp.float32),
        grid_spec=pltpu.PrefetchScalarGridSpec(
            num_scalar_prefetch=0,
            grid=(b, n_q),
            in_specs=[
                pl.BlockSpec((1, n_obs, p_dim + 1), lambda i, q: (i, 0, 0)),   # obs_in
                pl.BlockSpec((1, n_sup, p_dim), lambda i, q: (i, 0, 0)),       # support points
                pl.BlockSpec((1, n_sup, 1), lambda i, q: (i, 0, 0)),           # support labels
                pl.BlockSpec((1, tq, p_dim), lambda i, q: (i, q, 0)),          # query points
                pl.BlockSpec((p_dim + 1, h_dim), lambda i, q: (0, 0)),         # w1
                pl.BlockSpec((1, h_dim), lambda i, q: (0, 0)),                 # b1
                pl.BlockSpec((p_dim, h_dim), lambda i, q: (0, 0)),             # we1p
                pl.BlockSpec((h_dim, h_dim), lambda i, q: (0, 0)),             # we1c
                pl.BlockSpec((1, h_dim), lambda i, q: (0, 0)),                 # be1
                pl.BlockSpec((h_dim, f_dim), lambda i, q: (0, 0)),             # we2
                pl.BlockSpec((1, f_dim), lambda i, q: (0, 0)),                 # be2
                pl.BlockSpec((f_dim, 1), lambda i, q: (0, 0)),                 # wwf
                pl.BlockSpec((p_dim, 1), lambda i, q: (0, 0)),                 # wwp
                pl.BlockSpec((1, 1), lambda i, q: (0, 0)),                     # bw
            ],
            out_specs=pl.BlockSpec((1, 1, tq), lambda i, q: (i, 0, q)),
            scratch_shapes=[
                pltpu.VMEM((1, h_dim), jnp.float32),       # code bias (evaluate layer-1)
                pltpu.VMEM((n_sup, f_dim), jnp.float32),   # support features
                pltpu.VMEM((n_sup, 1), jnp.float32),       # alpha
            ],
        ),
        compiler_params=pltpu.CompilerParams(
            dimension_semantics=("arbitrary", "arbitrary")),
    )(obs_in, sup_pts, sup_lbl, query_points,
      w1, params["b1"], params["we1p"], params["we1c"], params["be1"],
      params["we2"], params["be2"], params["wwf"], params["wwp"], params["bw"])

    # kernel stores predictions lane-dense as [B, 1, M]; present the module's [B, M, 1]
    return jnp.swapaxes(out, 1, 2)


# ----- pure-JAX reference (correctness oracle) --------------------------------
def _reference_forward(observations, query_points, params):
    obs_pts, obs_lbl, sup_pts, sup_lbl = observations
    obs_in = jnp.concatenate([obs_pts, obs_lbl], axis=-1)
    w1 = jnp.concatenate([params["w1p"], params["w1l"]], axis=0)

    h = jax.nn.relu(obs_in @ w1 + params["b1"])
    code = jnp.mean(h, axis=1, keepdims=True)                               # [B, 1, H]

    def feat(pts):
        hh = jax.nn.relu(pts @ params["we1p"] + code @ params["we1c"] + params["be1"])
        return hh @ params["we2"] + params["be2"]

    sfeat = feat(sup_pts)                                                   # [B, N, F]
    w = jax.nn.sigmoid(sfeat @ params["wwf"] + sup_pts @ params["wwp"] + params["bw"])
    w = jnp.maximum(w, 1e-6)

    def sqd(a, b):
        aa = jnp.sum(a * a, axis=-1, keepdims=True)
        bb = jnp.sum(b * b, axis=-1, keepdims=True)
        return aa + jnp.swapaxes(bb, -1, -2) - 2.0 * a @ jnp.swapaxes(b, -1, -2)

    kxx = jnp.exp(-jnp.maximum(sqd(sfeat, sfeat) + sqd(sup_pts, sup_pts), 0.0) * _INV_2SIG2)
    a_mat = kxx + LAM * jnp.eye(sup_pts.shape[1], dtype=jnp.float32)[None] / w
    alpha = jnp.linalg.solve(a_mat, sup_lbl)                                # [B, N, 1]

    qfeat = feat(query_points)
    kqx = jnp.exp(
        -jnp.maximum(sqd(qfeat, sfeat) + sqd(query_points, sup_pts), 0.0) * _INV_2SIG2)
    return kqx @ alpha                                                      # [B, M, 1]


# ----- deterministic parameter init ------------------------------------------
def init_params(key):
    ks = jax.random.split(key, 8)

    def lin(k, fan_in, fan_out):
        return jax.random.normal(k, (fan_in, fan_out), jnp.float32) / jnp.sqrt(float(fan_in))

    return dict(
        # feature_field.encode MLP  (input = [points(3), labels(1)])
        w1p=lin(ks[0], P, H), w1l=lin(ks[1], 1, H), b1=jnp.zeros((1, H), jnp.float32),
        # feature_field.evaluate MLP (input = [points(3), code(H)])
        we1p=lin(ks[2], P, H), we1c=lin(ks[3], H, H), be1=jnp.zeros((1, H), jnp.float32),
        we2=lin(ks[4], H, F), be2=jnp.zeros((1, F), jnp.float32),
        # weight_model linear (input = [features(F), points(3)])
        wwf=lin(ks[5], F, 1), wwp=lin(ks[6], P, 1), bw=jnp.zeros((1, 1), jnp.float32),
    )


if __name__ == "__main__":
    key = jax.random.PRNGKey(0)
    k_obs, k_lbl, k_sup, k_slbl, k_q, k_par = jax.random.split(key, 6)

    obs_points = jax.random.normal(k_obs, (B, N_OBS, P), jnp.float32)
    obs_labels = jnp.sign(jax.random.normal(k_lbl, (B, N_OBS, 1), jnp.float32))
    support_points = jax.random.normal(k_sup, (B, N_SUP, P), jnp.float32)
    support_labels = jnp.sign(jax.random.normal(k_slbl, (B, N_SUP, 1), jnp.float32))
    query_points = jax.random.normal(k_q, (B, M, P), jnp.float32)

    params = init_params(k_par)
    observations = (obs_points, obs_labels, support_points, support_labels)

    fx = neural_kernel_field_forward(observations, query_points, params, chunk_size=-1)
    fx = jax.block_until_ready(fx)

    assert fx.shape == (B, M, 1), fx.shape
    assert fx.dtype == jnp.float32
    assert bool(jnp.all(jnp.isfinite(fx)))

    # correctness vs. pure-JAX reference (loose tolerance: the ridge 1/w uses the EUP's
    # approximate reciprocal and the in-kernel Gauss-Jordan differs from XLA's LU solve)
    ref = jax.block_until_ready(_reference_forward(observations, query_points, params))
    assert jnp.allclose(fx, ref, rtol=1e-2, atol=1e-2), float(jnp.max(jnp.abs(fx - ref)))

    print("KERNEL_OK")
</pallas_src>

<mosaic_0001>
module attributes {stable_mosaic.version = 11 : i64} {
  func.func @_nkf_kernel(%arg0: i32, %arg1: i32, %arg2: memref<1x8x4xf32, #tpu.memory_space<vmem>>, %arg3: memref<1x8x3xf32, #tpu.memory_space<vmem>>, %arg4: memref<1x8x1xf32, #tpu.memory_space<vmem>>, %arg5: memref<1x8x3xf32, #tpu.memory_space<vmem>>, %arg6: memref<4x32xf32, #tpu.memory_space<vmem>>, %arg7: memref<1x32xf32, #tpu.memory_space<vmem>>, %arg8: memref<3x32xf32, #tpu.memory_space<vmem>>, %arg9: memref<32x32xf32, #tpu.memory_space<vmem>>, %arg10: memref<1x32xf32, #tpu.memory_space<vmem>>, %arg11: memref<32x16xf32, #tpu.memory_space<vmem>>, %arg12: memref<1x16xf32, #tpu.memory_space<vmem>>, %arg13: memref<16x1xf32, #tpu.memory_space<vmem>>, %arg14: memref<3x1xf32, #tpu.memory_space<vmem>>, %arg15: memref<1x1xf32, #tpu.memory_space<vmem>>, %arg16: memref<1x1x8xf32, #tpu.memory_space<vmem>>, %arg17: memref<1x32xf32, #tpu.memory_space<vmem>>, %arg18: memref<8x16xf32, #tpu.memory_space<vmem>>, %arg19: memref<8x1xf32, #tpu.memory_space<vmem>>) attributes {dimension_semantics = [#tpu.dimension_semantics<arbitrary>, #tpu.dimension_semantics<arbitrary>], iteration_bounds = array<i64: 2, 1>, scalar_prefetch = 0 : i64, scratch_operands = 3 : i64, tpu.core_type = #tpu.core_type<tc>, window_params = [{transform_indices = @transform_0, window_bounds = array<i64: 1, 8, 4>}, {transform_indices = @transform_1, window_bounds = array<i64: 1, 8, 3>}, {transform_indices = @transform_2, window_bounds = array<i64: 1, 8, 1>}, {transform_indices = @transform_3, window_bounds = array<i64: 1, 8, 3>}, {pipeline_mode = #tpu.pipeline_mode<synchronous>, transform_indices = @transform_4, window_bounds = array<i64: 4, 32>}, {pipeline_mode = #tpu.pipeline_mode<synchronous>, transform_indices = @transform_5, window_bounds = array<i64: 1, 32>}, {pipeline_mode = #tpu.pipeline_mode<synchronous>, transform_indices = @transform_6, window_bounds = array<i64: 3, 32>}, {pipeline_mode = #tpu.pipeline_mode<synchronous>, transform_indices = @transform_7, window_bounds = array<i64: 32, 32>}, {pipeline_mode = #tpu.pipeline_mode<synchronous>, transform_indices = @transform_8, window_bounds = array<i64: 1, 32>}, {pipeline_mode = #tpu.pipeline_mode<synchronous>, transform_indices = @transform_9, window_bounds = array<i64: 32, 16>}, {pipeline_mode = #tpu.pipeline_mode<synchronous>, transform_indices = @transform_10, window_bounds = array<i64: 1, 16>}, {pipeline_mode = #tpu.pipeline_mode<synchronous>, transform_indices = @transform_11, window_bounds = array<i64: 16, 1>}, {pipeline_mode = #tpu.pipeline_mode<synchronous>, transform_indices = @transform_12, window_bounds = array<i64: 3, 1>}, {pipeline_mode = #tpu.pipeline_mode<synchronous>, transform_indices = @transform_13, window_bounds = array<i64: 1, 1>}, {transform_indices = @transform_14, window_bounds = array<i64: 1, 1, 8>}]} {
    %c0_i32 = arith.constant 0 : i32
    %0 = arith.cmpi eq, %arg1, %c0_i32 : i32
    %1 = arith.extui %0 : i1 to i32
    %c0_i32_0 = arith.constant 0 : i32
    %2 = arith.cmpi ne, %1, %c0_i32_0 : i32
    scf.if %2 {
      %c0_37 = arith.constant 0 : index
      %c0_38 = arith.constant 0 : index
      %c0_39 = arith.constant 0 : index
      %62 = vector.load %arg2[%c0_37, %c0_38, %c0_39] : memref<1x8x4xf32, #tpu.memory_space<vmem>>, vector<1x8x4xf32>
      %63 = vector.shape_cast %62 : vector<1x8x4xf32> to vector<8x4xf32>
      %c0_40 = arith.constant 0 : index
      %c0_41 = arith.constant 0 : index
      %c0_42 = arith.constant 0 : index
      %64 = vector.load %arg3[%c0_40, %c0_41, %c0_42] : memref<1x8x3xf32, #tpu.memory_space<vmem>>, vector<1x8x3xf32>
      %65 = vector.shape_cast %64 : vector<1x8x3xf32> to vector<8x3xf32>
      %c0_43 = arith.constant 0 : index
      %c0_44 = arith.constant 0 : index
      %c0_45 = arith.constant 0 : index
      %66 = vector.load %arg4[%c0_43, %c0_44, %c0_45] : memref<1x8x1xf32, #tpu.memory_space<vmem>>, vector<1x8x1xf32>
      %67 = vector.shape_cast %66 : vector<1x8x1xf32> to vector<8x1xf32>
      %c0_46 = arith.constant 0 : index
      %c0_47 = arith.constant 0 : index
      %68 = vector.load %arg6[%c0_46, %c0_47] : memref<4x32xf32, #tpu.memory_space<vmem>>, vector<4x32xf32>
      %cst_48 = arith.constant dense<0.000000e+00> : vector<8x32xf32>
      %69 = tpu.matmul %63, %68, %cst_48 {dimension_numbers = #tpu.dot_dimension_numbers<[1], [0], [0], [1], [0, 0, 1, 1], [], []>} : vector<8x4xf32>, vector<4x32xf32>, vector<8x32xf32> -> vector<8x32xf32>
      %c0_49 = arith.constant 0 : index
      %c0_50 = arith.constant 0 : index
      %70 = vector.load %arg7[%c0_49, %c0_50] : memref<1x32xf32, #tpu.memory_space<vmem>>, vector<1x32xf32>
      %71 = vector.broadcast %70 : vector<1x32xf32> to vector<8x32xf32>
      %72 = arith.addf %69, %71 : vector<8x32xf32>
      %cst_51 = arith.constant 0.000000e+00 : f32
      %73 = vector.broadcast %cst_51 : f32 to vector<8x32xf32>
      %74 = arith.maximumf %72, %73 : vector<8x32xf32>
      %cst_52 = arith.constant dense<0.000000e+00> : vector<32xf32>
      %75 = vector.multi_reduction <add>, %74, %cst_52 [0] : vector<8x32xf32> to vector<32xf32>
      %76 = vector.shape_cast %75 : vector<32xf32> to vector<1x32xf32>
      %cst_53 = arith.constant 8.000000e+00 : f32
      %77 = vector.broadcast %cst_53 : f32 to vector<1x32xf32>
      %78 = arith.divf %76, %77 : vector<1x32xf32>
      %c0_54 = arith.constant 0 : index
      %c0_55 = arith.constant 0 : index
      %79 = vector.load %arg9[%c0_54, %c0_55] : memref<32x32xf32, #tpu.memory_space<vmem>>, vector<32x32xf32>
      %cst_56 = arith.constant dense<0.000000e+00> : vector<1x32xf32>
      %80 = tpu.matmul %78, %79, %cst_56 {dimension_numbers = #tpu.dot_dimension_numbers<[1], [0], [0], [1], [0, 0, 1, 1], [], []>} : vector<1x32xf32>, vector<32x32xf32>, vector<1x32xf32> -> vector<1x32xf32>
      %c0_57 = arith.constant 0 : index
      %c0_58 = arith.constant 0 : index
      %81 = vector.load %arg10[%c0_57, %c0_58] : memref<1x32xf32, #tpu.memory_space<vmem>>, vector<1x32xf32>
      %82 = arith.addf %80, %81 : vector<1x32xf32>
      %c0_59 = arith.constant 0 : index
      %c0_60 = arith.constant 0 : index
      %83 = vector.load %arg17[%c0_59, %c0_60] : memref<1x32xf32, #tpu.memory_space<vmem>>, vector<1x32xf32>
      tpu.vector_store %arg17[%c0_59, %c0_60], %82 {strides = array<i32>} : memref<1x32xf32, #tpu.memory_space<vmem>>, vector<1x32xf32>,
      %c0_61 = arith.constant 0 : index
      %c0_62 = arith.constant 0 : index
      %84 = vector.load %arg8[%c0_61, %c0_62] : memref<3x32xf32, #tpu.memory_space<vmem>>, vector<3x32xf32>
      %cst_63 = arith.constant dense<0.000000e+00> : vector<8x32xf32>
      %85 = tpu.matmul %65, %84, %cst_63 {dimension_numbers = #tpu.dot_dimension_numbers<[1], [0], [0], [1], [0, 0, 1, 1], [], []>} : vector<8x3xf32>, vector<3x32xf32>, vector<8x32xf32> -> vector<8x32xf32>
      %86 = vector.broadcast %82 : vector<1x32xf32> to vector<8x32xf32>
      %87 = arith.addf %85, %86 : vector<8x32xf32>
      %cst_64 = arith.constant 0.000000e+00 : f32
      %88 = vector.broadcast %cst_64 : f32 to vector<8x32xf32>
      %89 = arith.maximumf %87, %88 : vector<8x32xf32>
      %c0_65 = arith.constant 0 : index
      %c0_66 = arith.constant 0 : index
      %90 = vector.load %arg11[%c0_65, %c0_66] : memref<32x16xf32, #tpu.memory_space<vmem>>, vector<32x16xf32>
      %cst_67 = arith.constant dense<0.000000e+00> : vector<8x16xf32>
      %91 = tpu.matmul %89, %90, %cst_67 {dimension_numbers = #tpu.dot_dimension_numbers<[1], [0], [0], [1], [0, 0, 1, 1], [], []>} : vector<8x32xf32>, vector<32x16xf32>, vector<8x16xf32> -> vector<8x16xf32>
      %c0_68 = arith.constant 0 : index
      %c0_69 = arith.constant 0 : index
      %92 = vector.load %arg12[%c0_68, %c0_69] : memref<1x16xf32, #tpu.memory_space<vmem>>, vector<1x16xf32>
      %93 = vector.broadcast %92 : vector<1x16xf32> to vector<8x16xf32>
      %94 = arith.addf %91, %93 : vector<8x16xf32>
      %c0_70 = arith.constant 0 : index
      %c0_71 = arith.constant 0 : index
      %95 = vector.load %arg18[%c0_70, %c0_71] : memref<8x16xf32, #tpu.memory_space<vmem>>, vector<8x16xf32>
      tpu.vector_store %arg18[%c0_70, %c0_71], %94 {strides = array<i32>} : memref<8x16xf32, #tpu.memory_space<vmem>>, vector<8x16xf32>,
      %c0_72 = arith.constant 0 : index
      %c0_73 = arith.constant 0 : index
      %96 = vector.load %arg13[%c0_72, %c0_73] : memref<16x1xf32, #tpu.memory_space<vmem>>, vector<16x1xf32>
      %cst_74 = arith.constant dense<0.000000e+00> : vector<8x1xf32>
      %97 = tpu.matmul %94, %96, %cst_74 {dimension_numbers = #tpu.dot_dimension_numbers<[1], [0], [0], [1], [0, 0, 1, 1], [], []>} : vector<8x16xf32>, vector<16x1xf32>, vector<8x1xf32> -> vector<8x1xf32>
      %c0_75 = arith.constant 0 : index
      %c0_76 = arith.constant 0 : index
      %98 = vector.load %arg14[%c0_75, %c0_76] : memref<3x1xf32, #tpu.memory_space<vmem>>, vector<3x1xf32>
      %cst_77 = arith.constant dense<0.000000e+00> : vector<8x1xf32>
      %99 = tpu.matmul %65, %98, %cst_77 {dimension_numbers = #tpu.dot_dimension_numbers<[1], [0], [0], [1], [0, 0, 1, 1], [], []>} : vector<8x3xf32>, vector<3x1xf32>, vector<8x1xf32> -> vector<8x1xf32>
      %100 = arith.addf %97, %99 : vector<8x1xf32>
      %c0_78 = arith.constant 0 : index
      %c0_79 = arith.constant 0 : index
      %101 = vector.load %arg15[%c0_78, %c0_79] : memref<1x1xf32, #tpu.memory_space<vmem>>, vector<1x1xf32>
      %102 = vector.broadcast %101 : vector<1x1xf32> to vector<8x1xf32>
      %103 = arith.addf %100, %102 : vector<8x1xf32>
      %104 = arith.negf %103 : vector<8x1xf32>
      %105 = math.exp %104 : vector<8x1xf32>
      %cst_80 = arith.constant 1.000000e+00 : f32
      %106 = vector.broadcast %cst_80 : f32 to vector<8x1xf32>
      %107 = arith.addf %106, %105 : vector<8x1xf32>
      %108 = arith.divf %106, %107 : vector<8x1xf32>
      %cst_81 = arith.constant 9.99999997E-7 : f32
      %109 = vector.broadcast %cst_81 : f32 to vector<8x1xf32>
      %110 = arith.maximumf %108, %109 : vector<8x1xf32>
      %111 = arith.mulf %94, %94 : vector<8x16xf32>
      %cst_82 = arith.constant dense<0.000000e+00> : vector<8xf32>
      %112 = vector.multi_reduction <add>, %111, %cst_82 [1] : vector<8x16xf32> to vector<8xf32>
      %113 = vector.shape_cast %112 : vector<8xf32> to vector<8x1xf32>
      %cst_83 = arith.constant 1.000000e+00 : f32
      %114 = vector.broadcast %cst_83 : f32 to vector<1x16xf32>
      %115 = arith.mulf %94, %94 : vector<8x16xf32>
      %cst_84 = arith.constant dense<0.000000e+00> : vector<1x8xf32>
      %116 = tpu.matmul %114, %115, %cst_84 {dimension_numbers = #tpu.dot_dimension_numbers<[1], [1], [0], [0], [0, 0, 1, 0], [], []>} : vector<1x16xf32>, vector<8x16xf32>, vector<1x8xf32> -> vector<1x8xf32>
      %cst_85 = arith.constant dense<0.000000e+00> : vector<8x8xf32>
      %117 = tpu.matmul %94, %94, %cst_85 {dimension_numbers = #tpu.dot_dimension_numbers<[1], [1], [0], [0], [0, 0, 1, 0], [], []>} : vector<8x16xf32>, vector<8x16xf32>, vector<8x8xf32> -> vector<8x8xf32>
      %118 = vector.broadcast %113 : vector<8x1xf32> to vector<8x8xf32>
      %119 = vector.broadcast %116 : vector<1x8xf32> to vector<8x8xf32>
      %120 = arith.addf %118, %119 : vector<8x8xf32>
      %cst_86 = arith.constant 2.000000e+00 : f32
      %121 = vector.broadcast %cst_86 : f32 to vector<8x8xf32>
      %122 = arith.mulf %121, %117 : vector<8x8xf32>
      %123 = arith.subf %120, %122 : vector<8x8xf32>
      %124 = arith.mulf %65, %65 : vector<8x3xf32>
      %cst_87 = arith.constant dense<0.000000e+00> : vector<8xf32>
      %125 = vector.multi_reduction <add>, %124, %cst_87 [1] : vector<8x3xf32> to vector<8xf32>
      %126 = vector.shape_cast %125 : vector<8xf32> to vector<8x1xf32>
      %cst_88 = arith.constant 1.000000e+00 : f32
      %127 = vector.broadcast %cst_88 : f32 to vector<1x3xf32>
      %128 = arith.mulf %65, %65 : vector<8x3xf32>
      %cst_89 = arith.constant dense<0.000000e+00> : vector<1x8xf32>
      %129 = tpu.matmul %127, %128, %cst_89 {dimension_numbers = #tpu.dot_dimension_numbers<[1], [1], [0], [0], [0, 0, 1, 0], [], []>} : vector<1x3xf32>, vector<8x3xf32>, vector<1x8xf32> -> vector<1x8xf32>
      %cst_90 = arith.constant dense<0.000000e+00> : vector<8x8xf32>
      %130 = tpu.matmul %65, %65, %cst_90 {dimension_numbers = #tpu.dot_dimension_numbers<[1], [1], [0], [0], [0, 0, 1, 0], [], []>} : vector<8x3xf32>, vector<8x3xf32>, vector<8x8xf32> -> vector<8x8xf32>
      %131 = vector.broadcast %126 : vector<8x1xf32> to vector<8x8xf32>
      %132 = vector.broadcast %129 : vector<1x8xf32> to vector<8x8xf32>
      %133 = arith.addf %131, %132 : vector<8x8xf32>
      %cst_91 = arith.constant 2.000000e+00 : f32
      %134 = vector.broadcast %cst_91 : f32 to vector<8x8xf32>
      %135 = arith.mulf %134, %130 : vector<8x8xf32>
      %136 = arith.subf %133, %135 : vector<8x8xf32>
      %137 = arith.addf %123, %136 : vector<8x8xf32>
      %cst_92 = arith.constant 0.000000e+00 : f32
      %138 = vector.broadcast %cst_92 : f32 to vector<8x8xf32>
      %139 = arith.maximumf %137, %138 : vector<8x8xf32>
      %cst_93 = arith.constant 0.000000e+00 : f32
      %140 = vector.broadcast %cst_93 : f32 to vector<8x8xf32>
      %141 = arith.subf %140, %139 : vector<8x8xf32>
      %cst_94 = arith.constant 2.000000e+00 : f32
      %142 = vector.broadcast %cst_94 : f32 to vector<8x8xf32>
      %143 = arith.mulf %141, %142 : vector<8x8xf32>
      %144 = math.exp %143 : vector<8x8xf32>
      %145 = tpu.iota {dimensions = array<i32: 0>} : vector<8x8xi32>
      %146 = tpu.iota {dimensions = array<i32: 1>} : vector<8x8xi32>
      %147 = arith.cmpi eq, %145, %146 : vector<8x8xi32>
      %148 = arith.extui %147 : vector<8x8xi1> to vector<8x8xi32>
      %149 = arith.sitofp %148 : vector<8x8xi32> to vector<8x8xf32>
      %cst_95 = arith.constant 0.00999999977 : f32
      %150 = vector.broadcast %cst_95 : f32 to vector<8x8xf32>
      %151 = arith.mulf %150, %149 : vector<8x8xf32>
      %152 = tpu.reciprocal %110 {approx = true} : vector<8x1xf32> -> vector<8x1xf32>
      %153 = vector.broadcast %152 : vector<8x1xf32> to vector<8x8xf32>
      %154 = arith.mulf %151, %153 : vector<8x8xf32>
      %155 = arith.addf %144, %154 : vector<8x8xf32>
      %156 = tpu.iota {dimensions = array<i32: 0>} : vector<8x8xi32>
      %157 = tpu.iota {dimensions = array<i32: 1>} : vector<8x8xi32>
      %158 = tpu.iota {dimensions = array<i32: 1>} : vector<1x8xi32>
      %159 = tpu.iota {dimensions = array<i32: 0>} : vector<8x1xi32>
      %160 = tpu.iota {dimensions = array<i32: 0>} : vector<8x1xi32>
      %c0_i32_96 = arith.constant 0 : i32
      %161 = vector.broadcast %c0_i32_96 : i32 to vector<8x8xi32>
      %162 = arith.cmpi eq, %156, %161 : vector<8x8xi32>
      %cst_97 = arith.constant 0.000000e+00 : f32
      %163 = vector.broadcast %cst_97 : f32 to vector<8x8xf32>
      %164 = arith.select %162, %155, %163 : vector<8x8xi1>, vector<8x8xf32>
      %cst_98 = arith.constant dense<0.000000e+00> : vector<8xf32>
      %165 = vector.multi_reduction <add>, %164, %cst_98 [0] : vector<8x8xf32> to vector<8xf32>
      %166 = vector.shape_cast %165 : vector<8xf32> to vector<1x8xf32>
      %c0_i32_99 = arith.constant 0 : i32
      %167 = vector.broadcast %c0_i32_99 : i32 to vector<8x1xi32>
      %168 = arith.cmpi eq, %160, %167 : vector<8x1xi32>
      %cst_100 = arith.constant 0.000000e+00 : f32
      %169 = vector.broadcast %cst_100 : f32 to vector<8x1xf32>
      %170 = arith.select %168, %67, %169 : vector<8x1xi1>, vector<8x1xf32>
      %cst_101 = arith.constant dense<0.000000e+00> : vector<1xf32>
      %171 = vector.multi_reduction <add>, %170, %cst_101 [0] : vector<8x1xf32> to vector<1xf32>
      %172 = vector.shape_cast %171 : vector<1xf32> to vector<1x1xf32>
      %c0_i32_102 = arith.constant 0 : i32
      %173 = vector.broadcast %c0_i32_102 : i32 to vector<1x8xi32>
      %174 = arith.cmpi eq, %158, %173 : vector<1x8xi32>
      %cst_103 = arith.constant 0.000000e+00 : f32
      %175 = vector.broadcast %cst_103 : f32 to vector<1x8xf32>
      %176 = arith.select %174, %166, %175 : vector<1x8xi1>, vector<1x8xf32>
      %cst_104 = arith.constant dense<0.000000e+00> : vector<1xf32>
      %177 = vector.multi_reduction <add>, %176, %cst_104 [1] : vector<1x8xf32> to vector<1xf32>
      %178 = vector.shape_cast %177 : vector<1xf32> to vector<1x1xf32>
      %cst_105 = arith.constant 1.000000e+00 : f32
      %179 = vector.broadcast %cst_105 : f32 to vector<1x1xf32>
      %180 = arith.divf %179, %178 : vector<1x1xf32>
      %181 = vector.broadcast %180 : vector<1x1xf32> to vector<1x8xf32>
      %182 = arith.mulf %166, %181 : vector<1x8xf32>
      %183 = arith.mulf %172, %180 : vector<1x1xf32>
      %c0_i32_106 = arith.constant 0 : i32
      %184 = vector.broadcast %c0_i32_106 : i32 to vector<8x8xi32>
      %185 = arith.cmpi eq, %157, %184 : vector<8x8xi32>
      %cst_107 = arith.constant 0.000000e+00 : f32
      %186 = vector.broadcast %cst_107 : f32 to vector<8x8xf32>
      %187 = arith.select %185, %155, %186 : vector<8x8xi1>, vector<8x8xf32>
      %cst_108 = arith.constant dense<0.000000e+00> : vector<8xf32>
      %188 = vector.multi_reduction <add>, %187, %cst_108 [1] : vector<8x8xf32> to vector<8xf32>
      %189 = vector.shape_cast %188 : vector<8xf32> to vector<8x1xf32>
      %c0_i32_109 = arith.constant 0 : i32
      %190 = vector.broadcast %c0_i32_109 : i32 to vector<8x1xi32>
      %191 = arith.cmpi eq, %159, %190 : vector<8x1xi32>
      %cst_110 = arith.constant 0.000000e+00 : f32
      %192 = vector.broadcast %cst_110 : f32 to vector<8x1xf32>
      %193 = arith.select %191, %192, %189 : vector<8x1xi1>, vector<8x1xf32>
      %194 = vector.broadcast %193 : vector<8x1xf32> to vector<8x8xf32>
      %195 = vector.broadcast %182 : vector<1x8xf32> to vector<8x8xf32>
      %196 = arith.mulf %194, %195 : vector<8x8xf32>
      %197 = arith.subf %155, %196 : vector<8x8xf32>
      %198 = vector.shape_cast %191 : vector<8x1xi1> to vector<8x1xi1>
      %199 = vector.broadcast %198 : vector<8x1xi1> to vector<8x8xi1>
      %200 = vector.shape_cast %182 : vector<1x8xf32> to vector<1x8xf32>
      %201 = vector.broadcast %200 : vector<1x8xf32> to vector<8x8xf32>
      %202 = arith.select %199, %201, %197 : vector<8x8xi1>, vector<8x8xf32>
      %203 = vector.broadcast %183 : vector<1x1xf32> to vector<8x1xf32>
      %204 = arith.mulf %193, %203 : vector<8x1xf32>
      %205 = arith.subf %67, %204 : vector<8x1xf32>
      %206 = vector.shape_cast %183 : vector<1x1xf32> to vector<1x1xf32>
      %207 = vector.broadcast %206 : vector<1x1xf32> to vector<8x1xf32>
      %208 = arith.select %191, %207, %205 : vector<8x1xi1>, vector<8x1xf32>
      %c1_i32 = arith.constant 1 : i32
      %209 = vector.broadcast %c1_i32 : i32 to vector<8x8xi32>
      %210 = arith.cmpi eq, %156, %209 : vector<8x8xi32>
      %cst_111 = arith.constant 0.000000e+00 : f32
      %211 = vector.broadcast %cst_111 : f32 to vector<8x8xf32>
      %212 = arith.select %210, %202, %211 : vector<8x8xi1>, vector<8x8xf32>
      %cst_112 = arith.constant dense<0.000000e+00> : vector<8xf32>
      %213 = vector.multi_reduction <add>, %212, %cst_112 [0] : vector<8x8xf32> to vector<8xf32>
      %214 = vector.shape_cast %213 : vector<8xf32> to vector<1x8xf32>
      %c1_i32_113 = arith.constant 1 : i32
      %215 = vector.broadcast %c1_i32_113 : i32 to vector<8x1xi32>
      %216 = arith.cmpi eq, %160, %215 : vector<8x1xi32>
      %cst_114 = arith.constant 0.000000e+00 : f32
      %217 = vector.broadcast %cst_114 : f32 to vector<8x1xf32>
      %218 = arith.select %216, %208, %217 : vector<8x1xi1>, vector<8x1xf32>
      %cst_115 = arith.constant dense<0.000000e+00> : vector<1xf32>
      %219 = vector.multi_reduction <add>, %218, %cst_115 [0] : vector<8x1xf32> to vector<1xf32>
      %220 = vector.shape_cast %219 : vector<1xf32> to vector<1x1xf32>
      %c1_i32_116 = arith.constant 1 : i32
      %221 = vector.broadcast %c1_i32_116 : i32 to vector<1x8xi32>
      %222 = arith.cmpi eq, %158, %221 : vector<1x8xi32>
      %cst_117 = arith.constant 0.000000e+00 : f32
      %223 = vector.broadcast %cst_117 : f32 to vector<1x8xf32>
      %224 = arith.select %222, %214, %223 : vector<1x8xi1>, vector<1x8xf32>
      %cst_118 = arith.constant dense<0.000000e+00> : vector<1xf32>
      %225 = vector.multi_reduction <add>, %224, %cst_118 [1] : vector<1x8xf32> to vector<1xf32>
      %226 = vector.shape_cast %225 : vector<1xf32> to vector<1x1xf32>
      %cst_119 = arith.constant 1.000000e+00 : f32
      %227 = vector.broadcast %cst_119 : f32 to vector<1x1xf32>
      %228 = arith.divf %227, %226 : vector<1x1xf32>
      %229 = vector.broadcast %228 : vector<1x1xf32> to vector<1x8xf32>
      %230 = arith.mulf %214, %229 : vector<1x8xf32>
      %231 = arith.mulf %220, %228 : vector<1x1xf32>
      %c1_i32_120 = arith.constant 1 : i32
      %232 = vector.broadcast %c1_i32_120 : i32 to vector<8x8xi32>
      %233 = arith.cmpi eq, %157, %232 : vector<8x8xi32>
      %cst_121 = arith.constant 0.000000e+00 : f32
      %234 = vector.broadcast %cst_121 : f32 to vector<8x8xf32>
      %235 = arith.select %233, %202, %234 : vector<8x8xi1>, vector<8x8xf32>
      %cst_122 = arith.constant dense<0.000000e+00> : vector<8xf32>
      %236 = vector.multi_reduction <add>, %235, %cst_122 [1] : vector<8x8xf32> to vector<8xf32>
      %237 = vector.shape_cast %236 : vector<8xf32> to vector<8x1xf32>
      %c1_i32_123 = arith.constant 1 : i32
      %238 = vector.broadcast %c1_i32_123 : i32 to vector<8x1xi32>
      %239 = arith.cmpi eq, %159, %238 : vector<8x1xi32>
      %cst_124 = arith.constant 0.000000e+00 : f32
      %240 = vector.broadcast %cst_124 : f32 to vector<8x1xf32>
      %241 = arith.select %239, %240, %237 : vector<8x1xi1>, vector<8x1xf32>
      %242 = vector.broadcast %241 : vector<8x1xf32> to vector<8x8xf32>
      %243 = vector.broadcast %230 : vector<1x8xf32> to vector<8x8xf32>
      %244 = arith.mulf %242, %243 : vector<8x8xf32>
      %245 = arith.subf %202, %244 : vector<8x8xf32>
      %246 = vector.shape_cast %239 : vector<8x1xi1> to vector<8x1xi1>
      %247 = vector.broadcast %246 : vector<8x1xi1> to vector<8x8xi1>
      %248 = vector.shape_cast %230 : vector<1x8xf32> to vector<1x8xf32>
      %249 = vector.broadcast %248 : vector<1x8xf32> to vector<8x8xf32>
      %250 = arith.select %247, %249, %245 : vector<8x8xi1>, vector<8x8xf32>
      %251 = vector.broadcast %231 : vector<1x1xf32> to vector<8x1xf32>
      %252 = arith.mulf %241, %251 : vector<8x1xf32>
      %253 = arith.subf %208, %252 : vector<8x1xf32>
      %254 = vector.shape_cast %231 : vector<1x1xf32> to vector<1x1xf32>
      %255 = vector.broadcast %254 : vector<1x1xf32> to vector<8x1xf32>
      %256 = arith.select %239, %255, %253 : vector<8x1xi1>, vector<8x1xf32>
      %c2_i32 = arith.constant 2 : i32
      %257 = vector.broadcast %c2_i32 : i32 to vector<8x8xi32>
      %258 = arith.cmpi eq, %156, %257 : vector<8x8xi32>
      %cst_125 = arith.constant 0.000000e+00 : f32
      %259 = vector.broadcast %cst_125 : f32 to vector<8x8xf32>
      %260 = arith.select %258, %250, %259 : vector<8x8xi1>, vector<8x8xf32>
      %cst_126 = arith.constant dense<0.000000e+00> : vector<8xf32>
      %261 = vector.multi_reduction <add>, %260, %cst_126 [0] : vector<8x8xf32> to vector<8xf32>
      %262 = vector.shape_cast %261 : vector<8xf32> to vector<1x8xf32>
      %c2_i32_127 = arith.constant 2 : i32
      %263 = vector.broadcast %c2_i32_127 : i32 to vector<8x1xi32>
      %264 = arith.cmpi eq, %160, %263 : vector<8x1xi32>
      %cst_128 = arith.constant 0.000000e+00 : f32
      %265 = vector.broadcast %cst_128 : f32 to vector<8x1xf32>
      %266 = arith.select %264, %256, %265 : vector<8x1xi1>, vector<8x1xf32>
      %cst_129 = arith.constant dense<0.000000e+00> : vector<1xf32>
      %267 = vector.multi_reduction <add>, %266, %cst_129 [0] : vector<8x1xf32> to vector<1xf32>
      %268 = vector.shape_cast %267 : vector<1xf32> to vector<1x1xf32>
      %c2_i32_130 = arith.constant 2 : i32
      %269 = vector.broadcast %c2_i32_130 : i32 to vector<1x8xi32>
      %270 = arith.cmpi eq, %158, %269 : vector<1x8xi32>
      %cst_131 = arith.constant 0.000000e+00 : f32
      %271 = vector.broadcast %cst_131 : f32 to vector<1x8xf32>
      %272 = arith.select %270, %262, %271 : vector<1x8xi1>, vector<1x8xf32>
      %cst_132 = arith.constant dense<0.000000e+00> : vector<1xf32>
      %273 = vector.multi_reduction <add>, %272, %cst_132 [1] : vector<1x8xf32> to vector<1xf32>
      %274 = vector.shape_cast %273 : vector<1xf32> to vector<1x1xf32>
      %cst_133 = arith.constant 1.000000e+00 : f32
      %275 = vector.broadcast %cst_133 : f32 to vector<1x1xf32>
      %276 = arith.divf %275, %274 : vector<1x1xf32>
      %277 = vector.broadcast %276 : vector<1x1xf32> to vector<1x8xf32>
      %278 = arith.mulf %262, %277 : vector<1x8xf32>
      %279 = arith.mulf %268, %276 : vector<1x1xf32>
      %c2_i32_134 = arith.constant 2 : i32
      %280 = vector.broadcast %c2_i32_134 : i32 to vector<8x8xi32>
      %281 = arith.cmpi eq, %157, %280 : vector<8x8xi32>
      %cst_135 = arith.constant 0.000000e+00 : f32
      %282 = vector.broadcast %cst_135 : f32 to vector<8x8xf32>
      %283 = arith.select %281, %250, %282 : vector<8x8xi1>, vector<8x8xf32>
      %cst_136 = arith.constant dense<0.000000e+00> : vector<8xf32>
      %284 = vector.multi_reduction <add>, %283, %cst_136 [1] : vector<8x8xf32> to vector<8xf32>
      %285 = vector.shape_cast %284 : vector<8xf32> to vector<8x1xf32>
      %c2_i32_137 = arith.constant 2 : i32
      %286 = vector.broadcast %c2_i32_137 : i32 to vector<8x1xi32>
      %287 = arith.cmpi eq, %159, %286 : vector<8x1xi32>
      %cst_138 = arith.constant 0.000000e+00 : f32
      %288 = vector.broadcast %cst_138 : f32 to vector<8x1xf32>
      %289 = arith.select %287, %288, %285 : vector<8x1xi1>, vector<8x1xf32>
      %290 = vector.broadcast %289 : vector<8x1xf32> to vector<8x8xf32>
      %291 = vector.broadcast %278 : vector<1x8xf32> to vector<8x8xf32>
      %292 = arith.mulf %290, %291 : vector<8x8xf32>
      %293 = arith.subf %250, %292 : vector<8x8xf32>
      %294 = vector.shape_cast %287 : vector<8x1xi1> to vector<8x1xi1>
      %295 = vector.broadcast %294 : vector<8x1xi1> to vector<8x8xi1>
      %296 = vector.shape_cast %278 : vector<1x8xf32> to vector<1x8xf32>
      %297 = vector.broadcast %296 : vector<1x8xf32> to vector<8x8xf32>
      %298 = arith.select %295, %297, %293 : vector<8x8xi1>, vector<8x8xf32>
      %299 = vector.broadcast %279 : vector<1x1xf32> to vector<8x1xf32>
      %300 = arith.mulf %289, %299 : vector<8x1xf32>
      %301 = arith.subf %256, %300 : vector<8x1xf32>
      %302 = vector.shape_cast %279 : vector<1x1xf32> to vector<1x1xf32>
      %303 = vector.broadcast %302 : vector<1x1xf32> to vector<8x1xf32>
      %304 = arith.select %287, %303, %301 : vector<8x1xi1>, vector<8x1xf32>
      %c3_i32 = arith.constant 3 : i32
      %305 = vector.broadcast %c3_i32 : i32 to vector<8x8xi32>
      %306 = arith.cmpi eq, %156, %305 : vector<8x8xi32>
      %cst_139 = arith.constant 0.000000e+00 : f32
      %307 = vector.broadcast %cst_139 : f32 to vector<8x8xf32>
      %308 = arith.select %306, %298, %307 : vector<8x8xi1>, vector<8x8xf32>
      %cst_140 = arith.constant dense<0.000000e+00> : vector<8xf32>
      %309 = vector.multi_reduction <add>, %308, %cst_140 [0] : vector<8x8xf32> to vector<8xf32>
      %310 = vector.shape_cast %309 : vector<8xf32> to vector<1x8xf32>
      %c3_i32_141 = arith.constant 3 : i32
      %311 = vector.broadcast %c3_i32_141 : i32 to vector<8x1xi32>
      %312 = arith.cmpi eq, %160, %311 : vector<8x1xi32>
      %cst_142 = arith.constant 0.000000e+00 : f32
      %313 = vector.broadcast %cst_142 : f32 to vector<8x1xf32>
      %314 = arith.select %312, %304, %313 : vector<8x1xi1>, vector<8x1xf32>
      %cst_143 = arith.constant dense<0.000000e+00> : vector<1xf32>
      %315 = vector.multi_reduction <add>, %314, %cst_143 [0] : vector<8x1xf32> to vector<1xf32>
      %316 = vector.shape_cast %315 : vector<1xf32> to vector<1x1xf32>
      %c3_i32_144 = arith.constant 3 : i32
      %317 = vector.broadcast %c3_i32_144 : i32 to vector<1x8xi32>
      %318 = arith.cmpi eq, %158, %317 : vector<1x8xi32>
      %cst_145 = arith.constant 0.000000e+00 : f32
      %319 = vector.broadcast %cst_145 : f32 to vector<1x8xf32>
      %320 = arith.select %318, %310, %319 : vector<1x8xi1>, vector<1x8xf32>
      %cst_146 = arith.constant dense<0.000000e+00> : vector<1xf32>
      %321 = vector.multi_reduction <add>, %320, %cst_146 [1] : vector<1x8xf32> to vector<1xf32>
      %322 = vector.shape_cast %321 : vector<1xf32> to vector<1x1xf32>
      %cst_147 = arith.constant 1.000000e+00 : f32
      %323 = vector.broadcast %cst_147 : f32 to vector<1x1xf32>
      %324 = arith.divf %323, %322 : vector<1x1xf32>
      %325 = vector.broadcast %324 : vector<1x1xf32> to vector<1x8xf32>
      %326 = arith.mulf %310, %325 : vector<1x8xf32>
      %327 = arith.mulf %316, %324 : vector<1x1xf32>
      %c3_i32_148 = arith.constant 3 : i32
      %328 = vector.broadcast %c3_i32_148 : i32 to vector<8x8xi32>
      %329 = arith.cmpi eq, %157, %328 : vector<8x8xi32>
      %cst_149 = arith.constant 0.000000e+00 : f32
      %330 = vector.broadcast %cst_149 : f32 to vector<8x8xf32>
      %331 = arith.select %329, %298, %330 : vector<8x8xi1>, vector<8x8xf32>
      %cst_150 = arith.constant dense<0.000000e+00> : vector<8xf32>
      %332 = vector.multi_reduction <add>, %331, %cst_150 [1] : vector<8x8xf32> to vector<8xf32>
      %333 = vector.shape_cast %332 : vector<8xf32> to vector<8x1xf32>
      %c3_i32_151 = arith.constant 3 : i32
      %334 = vector.broadcast %c3_i32_151 : i32 to vector<8x1xi32>
      %335 = arith.cmpi eq, %159, %334 : vector<8x1xi32>
      %cst_152 = arith.constant 0.000000e+00 : f32
      %336 = vector.broadcast %cst_152 : f32 to vector<8x1xf32>
      %337 = arith.select %335, %336, %333 : vector<8x1xi1>, vector<8x1xf32>
      %338 = vector.broadcast %337 : vector<8x1xf32> to vector<8x8xf32>
      %339 = vector.broadcast %326 : vector<1x8xf32> to vector<8x8xf32>
      %340 = arith.mulf %338, %339 : vector<8x8xf32>
      %341 = arith.subf %298, %340 : vector<8x8xf32>
      %342 = vector.shape_cast %335 : vector<8x1xi1> to vector<8x1xi1>
      %343 = vector.broadcast %342 : vector<8x1xi1> to vector<8x8xi1>
      %344 = vector.shape_cast %326 : vector<1x8xf32> to vector<1x8xf32>
      %345 = vector.broadcast %344 : vector<1x8xf32> to vector<8x8xf32>
      %346 = arith.select %343, %345, %341 : vector<8x8xi1>, vector<8x8xf32>
      %347 = vector.broadcast %327 : vector<1x1xf32> to vector<8x1xf32>
      %348 = arith.mulf %337, %347 : vector<8x1xf32>
      %349 = arith.subf %304, %348 : vector<8x1xf32>
      %350 = vector.shape_cast %327 : vector<1x1xf32> to vector<1x1xf32>
      %351 = vector.broadcast %350 : vector<1x1xf32> to vector<8x1xf32>
      %352 = arith.select %335, %351, %349 : vector<8x1xi1>, vector<8x1xf32>
      %c4_i32 = arith.constant 4 : i32
      %353 = vector.broadcast %c4_i32 : i32 to vector<8x8xi32>
      %354 = arith.cmpi eq, %156, %353 : vector<8x8xi32>
      %cst_153 = arith.constant 0.000000e+00 : f32
      %355 = vector.broadcast %cst_153 : f32 to vector<8x8xf32>
      %356 = arith.select %354, %346, %355 : vector<8x8xi1>, vector<8x8xf32>
      %cst_154 = arith.constant dense<0.000000e+00> : vector<8xf32>
      %357 = vector.multi_reduction <add>, %356, %cst_154 [0] : vector<8x8xf32> to vector<8xf32>
      %358 = vector.shape_cast %357 : vector<8xf32> to vector<1x8xf32>
      %c4_i32_155 = arith.constant 4 : i32
      %359 = vector.broadcast %c4_i32_155 : i32 to vector<8x1xi32>
      %360 = arith.cmpi eq, %160, %359 : vector<8x1xi32>
      %cst_156 = arith.constant 0.000000e+00 : f32
      %361 = vector.broadcast %cst_156 : f32 to vector<8x1xf32>
      %362 = arith.select %360, %352, %361 : vector<8x1xi1>, vector<8x1xf32>
      %cst_157 = arith.constant dense<0.000000e+00> : vector<1xf32>
      %363 = vector.multi_reduction <add>, %362, %cst_157 [0] : vector<8x1xf32> to vector<1xf32>
      %364 = vector.shape_cast %363 : vector<1xf32> to vector<1x1xf32>
      %c4_i32_158 = arith.constant 4 : i32
      %365 = vector.broadcast %c4_i32_158 : i32 to vector<1x8xi32>
      %366 = arith.cmpi eq, %158, %365 : vector<1x8xi32>
      %cst_159 = arith.constant 0.000000e+00 : f32
      %367 = vector.broadcast %cst_159 : f32 to vector<1x8xf32>
      %368 = arith.select %366, %358, %367 : vector<1x8xi1>, vector<1x8xf32>
      %cst_160 = arith.constant dense<0.000000e+00> : vector<1xf32>
      %369 = vector.multi_reduction <add>, %368, %cst_160 [1] : vector<1x8xf32> to vector<1xf32>
      %370 = vector.shape_cast %369 : vector<1xf32> to vector<1x1xf32>
      %cst_161 = arith.constant 1.000000e+00 : f32
      %371 = vector.broadcast %cst_161 : f32 to vector<1x1xf32>
      %372 = arith.divf %371, %370 : vector<1x1xf32>
      %373 = vector.broadcast %372 : vector<1x1xf32> to vector<1x8xf32>
      %374 = arith.mulf %358, %373 : vector<1x8xf32>
      %375 = arith.mulf %364, %372 : vector<1x1xf32>
      %c4_i32_162 = arith.constant 4 : i32
      %376 = vector.broadcast %c4_i32_162 : i32 to vector<8x8xi32>
      %377 = arith.cmpi eq, %157, %376 : vector<8x8xi32>
      %cst_163 = arith.constant 0.000000e+00 : f32
      %378 = vector.broadcast %cst_163 : f32 to vector<8x8xf32>
      %379 = arith.select %377, %346, %378 : vector<8x8xi1>, vector<8x8xf32>
      %cst_164 = arith.constant dense<0.000000e+00> : vector<8xf32>
      %380 = vector.multi_reduction <add>, %379, %cst_164 [1] : vector<8x8xf32> to vector<8xf32>
      %381 = vector.shape_cast %380 : vector<8xf32> to vector<8x1xf32>
      %c4_i32_165 = arith.constant 4 : i32
      %382 = vector.broadcast %c4_i32_165 : i32 to vector<8x1xi32>
      %383 = arith.cmpi eq, %159, %382 : vector<8x1xi32>
      %cst_166 = arith.constant 0.000000e+00 : f32
      %384 = vector.broadcast %cst_166 : f32 to vector<8x1xf32>
      %385 = arith.select %383, %384, %381 : vector<8x1xi1>, vector<8x1xf32>
      %386 = vector.broadcast %385 : vector<8x1xf32> to vector<8x8xf32>
      %387 = vector.broadcast %374 : vector<1x8xf32> to vector<8x8xf32>
      %388 = arith.mulf %386, %387 : vector<8x8xf32>
      %389 = arith.subf %346, %388 : vector<8x8xf32>
      %390 = vector.shape_cast %383 : vector<8x1xi1> to vector<8x1xi1>
      %391 = vector.broadcast %390 : vector<8x1xi1> to vector<8x8xi1>
      %392 = vector.shape_cast %374 : vector<1x8xf32> to vector<1x8xf32>
      %393 = vector.broadcast %392 : vector<1x8xf32> to vector<8x8xf32>
      %394 = arith.select %391, %393, %389 : vector<8x8xi1>, vector<8x8xf32>
      %395 = vector.broadcast %375 : vector<1x1xf32> to vector<8x1xf32>
      %396 = arith.mulf %385, %395 : vector<8x1xf32>
      %397 = arith.subf %352, %396 : vector<8x1xf32>
      %398 = vector.shape_cast %375 : vector<1x1xf32> to vector<1x1xf32>
      %399 = vector.broadcast %398 : vector<1x1xf32> to vector<8x1xf32>
      %400 = arith.select %383, %399, %397 : vector<8x1xi1>, vector<8x1xf32>
      %c5_i32 = arith.constant 5 : i32
      %401 = vector.broadcast %c5_i32 : i32 to vector<8x8xi32>
      %402 = arith.cmpi eq, %156, %401 : vector<8x8xi32>
      %cst_167 = arith.constant 0.000000e+00 : f32
      %403 = vector.broadcast %cst_167 : f32 to vector<8x8xf32>
      %404 = arith.select %402, %394, %403 : vector<8x8xi1>, vector<8x8xf32>
      %cst_168 = arith.constant dense<0.000000e+00> : vector<8xf32>
      %405 = vector.multi_reduction <add>, %404, %cst_168 [0] : vector<8x8xf32> to vector<8xf32>
      %406 = vector.shape_cast %405 : vector<8xf32> to vector<1x8xf32>
      %c5_i32_169 = arith.constant 5 : i32
      %407 = vector.broadcast %c5_i32_169 : i32 to vector<8x1xi32>
      %408 = arith.cmpi eq, %160, %407 : vector<8x1xi32>
      %cst_170 = arith.constant 0.000000e+00 : f32
      %409 = vector.broadcast %cst_170 : f32 to vector<8x1xf32>
      %410 = arith.select %408, %400, %409 : vector<8x1xi1>, vector<8x1xf32>
      %cst_171 = arith.constant dense<0.000000e+00> : vector<1xf32>
      %411 = vector.multi_reduction <add>, %410, %cst_171 [0] : vector<8x1xf32> to vector<1xf32>
      %412 = vector.shape_cast %411 : vector<1xf32> to vector<1x1xf32>
      %c5_i32_172 = arith.constant 5 : i32
      %413 = vector.broadcast %c5_i32_172 : i32 to vector<1x8xi32>
      %414 = arith.cmpi eq, %158, %413 : vector<1x8xi32>
      %cst_173 = arith.constant 0.000000e+00 : f32
      %415 = vector.broadcast %cst_173 : f32 to vector<1x8xf32>
      %416 = arith.select %414, %406, %415 : vector<1x8xi1>, vector<1x8xf32>
      %cst_174 = arith.constant dense<0.000000e+00> : vector<1xf32>
      %417 = vector.multi_reduction <add>, %416, %cst_174 [1] : vector<1x8xf32> to vector<1xf32>
      %418 = vector.shape_cast %417 : vector<1xf32> to vector<1x1xf32>
      %cst_175 = arith.constant 1.000000e+00 : f32
      %419 = vector.broadcast %cst_175 : f32 to vector<1x1xf32>
      %420 = arith.divf %419, %418 : vector<1x1xf32>
      %421 = vector.broadcast %420 : vector<1x1xf32> to vector<1x8xf32>
      %422 = arith.mulf %406, %421 : vector<1x8xf32>
      %423 = arith.mulf %412, %420 : vector<1x1xf32>
      %c5_i32_176 = arith.constant 5 : i32
      %424 = vector.broadcast %c5_i32_176 : i32 to vector<8x8xi32>
      %425 = arith.cmpi eq, %157, %424 : vector<8x8xi32>
      %cst_177 = arith.constant 0.000000e+00 : f32
      %426 = vector.broadcast %cst_177 : f32 to vector<8x8xf32>
      %427 = arith.select %425, %394, %426 : vector<8x8xi1>, vector<8x8xf32>
      %cst_178 = arith.constant dense<0.000000e+00> : vector<8xf32>
      %428 = vector.multi_reduction <add>, %427, %cst_178 [1] : vector<8x8xf32> to vector<8xf32>
      %429 = vector.shape_cast %428 : vector<8xf32> to vector<8x1xf32>
      %c5_i32_179 = arith.constant 5 : i32
      %430 = vector.broadcast %c5_i32_179 : i32 to vector<8x1xi32>
      %431 = arith.cmpi eq, %159, %430 : vector<8x1xi32>
      %cst_180 = arith.constant 0.000000e+00 : f32
      %432 = vector.broadcast %cst_180 : f32 to vector<8x1xf32>
      %433 = arith.select %431, %432, %429 : vector<8x1xi1>, vector<8x1xf32>
      %434 = vector.broadcast %433 : vector<8x1xf32> to vector<8x8xf32>
      %435 = vector.broadcast %422 : vector<1x8xf32> to vector<8x8xf32>
      %436 = arith.mulf %434, %435 : vector<8x8xf32>
      %437 = arith.subf %394, %436 : vector<8x8xf32>
      %438 = vector.shape_cast %431 : vector<8x1xi1> to vector<8x1xi1>
      %439 = vector.broadcast %438 : vector<8x1xi1> to vector<8x8xi1>
      %440 = vector.shape_cast %422 : vector<1x8xf32> to vector<1x8xf32>
      %441 = vector.broadcast %440 : vector<1x8xf32> to vector<8x8xf32>
      %442 = arith.select %439, %441, %437 : vector<8x8xi1>, vector<8x8xf32>
      %443 = vector.broadcast %423 : vector<1x1xf32> to vector<8x1xf32>
      %444 = arith.mulf %433, %443 : vector<8x1xf32>
      %445 = arith.subf %400, %444 : vector<8x1xf32>
      %446 = vector.shape_cast %423 : vector<1x1xf32> to vector<1x1xf32>
      %447 = vector.broadcast %446 : vector<1x1xf32> to vector<8x1xf32>
      %448 = arith.select %431, %447, %445 : vector<8x1xi1>, vector<8x1xf32>
      %c6_i32 = arith.constant 6 : i32
      %449 = vector.broadcast %c6_i32 : i32 to vector<8x8xi32>
      %450 = arith.cmpi eq, %156, %449 : vector<8x8xi32>
      %cst_181 = arith.constant 0.000000e+00 : f32
      %451 = vector.broadcast %cst_181 : f32 to vector<8x8xf32>
      %452 = arith.select %450, %442, %451 : vector<8x8xi1>, vector<8x8xf32>
      %cst_182 = arith.constant dense<0.000000e+00> : vector<8xf32>
      %453 = vector.multi_reduction <add>, %452, %cst_182 [0] : vector<8x8xf32> to vector<8xf32>
      %454 = vector.shape_cast %453 : vector<8xf32> to vector<1x8xf32>
      %c6_i32_183 = arith.constant 6 : i32
      %455 = vector.broadcast %c6_i32_183 : i32 to vector<8x1xi32>
      %456 = arith.cmpi eq, %160, %455 : vector<8x1xi32>
      %cst_184 = arith.constant 0.000000e+00 : f32
      %457 = vector.broadcast %cst_184 : f32 to vector<8x1xf32>
      %458 = arith.select %456, %448, %457 : vector<8x1xi1>, vector<8x1xf32>
      %cst_185 = arith.constant dense<0.000000e+00> : vector<1xf32>
      %459 = vector.multi_reduction <add>, %458, %cst_185 [0] : vector<8x1xf32> to vector<1xf32>
      %460 = vector.shape_cast %459 : vector<1xf32> to vector<1x1xf32>
      %c6_i32_186 = arith.constant 6 : i32
      %461 = vector.broadcast %c6_i32_186 : i32 to vector<1x8xi32>
      %462 = arith.cmpi eq, %158, %461 : vector<1x8xi32>
      %cst_187 = arith.constant 0.000000e+00 : f32
      %463 = vector.broadcast %cst_187 : f32 to vector<1x8xf32>
      %464 = arith.select %462, %454, %463 : vector<1x8xi1>, vector<1x8xf32>
      %cst_188 = arith.constant dense<0.000000e+00> : vector<1xf32>
      %465 = vector.multi_reduction <add>, %464, %cst_188 [1] : vector<1x8xf32> to vector<1xf32>
      %466 = vector.shape_cast %465 : vector<1xf32> to vector<1x1xf32>
      %cst_189 = arith.constant 1.000000e+00 : f32
      %467 = vector.broadcast %cst_189 : f32 to vector<1x1xf32>
      %468 = arith.divf %467, %466 : vector<1x1xf32>
      %469 = vector.broadcast %468 : vector<1x1xf32> to vector<1x8xf32>
      %470 = arith.mulf %454, %469 : vector<1x8xf32>
      %471 = arith.mulf %460, %468 : vector<1x1xf32>
      %c6_i32_190 = arith.constant 6 : i32
      %472 = vector.broadcast %c6_i32_190 : i32 to vector<8x8xi32>
      %473 = arith.cmpi eq, %157, %472 : vector<8x8xi32>
      %cst_191 = arith.constant 0.000000e+00 : f32
      %474 = vector.broadcast %cst_191 : f32 to vector<8x8xf32>
      %475 = arith.select %473, %442, %474 : vector<8x8xi1>, vector<8x8xf32>
      %cst_192 = arith.constant dense<0.000000e+00> : vector<8xf32>
      %476 = vector.multi_reduction <add>, %475, %cst_192 [1] : vector<8x8xf32> to vector<8xf32>
      %477 = vector.shape_cast %476 : vector<8xf32> to vector<8x1xf32>
      %c6_i32_193 = arith.constant 6 : i32
      %478 = vector.broadcast %c6_i32_193 : i32 to vector<8x1xi32>
      %479 = arith.cmpi eq, %159, %478 : vector<8x1xi32>
      %cst_194 = arith.constant 0.000000e+00 : f32
      %480 = vector.broadcast %cst_194 : f32 to vector<8x1xf32>
      %481 = arith.select %479, %480, %477 : vector<8x1xi1>, vector<8x1xf32>
      %482 = vector.broadcast %481 : vector<8x1xf32> to vector<8x8xf32>
      %483 = vector.broadcast %470 : vector<1x8xf32> to vector<8x8xf32>
      %484 = arith.mulf %482, %483 : vector<8x8xf32>
      %485 = arith.subf %442, %484 : vector<8x8xf32>
      %486 = vector.shape_cast %479 : vector<8x1xi1> to vector<8x1xi1>
      %487 = vector.broadcast %486 : vector<8x1xi1> to vector<8x8xi1>
      %488 = vector.shape_cast %470 : vector<1x8xf32> to vector<1x8xf32>
      %489 = vector.broadcast %488 : vector<1x8xf32> to vector<8x8xf32>
      %490 = arith.select %487, %489, %485 : vector<8x8xi1>, vector<8x8xf32>
      %491 = vector.broadcast %471 : vector<1x1xf32> to vector<8x1xf32>
      %492 = arith.mulf %481, %491 : vector<8x1xf32>
      %493 = arith.subf %448, %492 : vector<8x1xf32>
      %494 = vector.shape_cast %471 : vector<1x1xf32> to vector<1x1xf32>
      %495 = vector.broadcast %494 : vector<1x1xf32> to vector<8x1xf32>
      %496 = arith.select %479, %495, %493 : vector<8x1xi1>, vector<8x1xf32>
      %c7_i32 = arith.constant 7 : i32
      %497 = vector.broadcast %c7_i32 : i32 to vector<8x8xi32>
      %498 = arith.cmpi eq, %156, %497 : vector<8x8xi32>
      %cst_195 = arith.constant 0.000000e+00 : f32
      %499 = vector.broadcast %cst_195 : f32 to vector<8x8xf32>
      %500 = arith.select %498, %490, %499 : vector<8x8xi1>, vector<8x8xf32>
      %cst_196 = arith.constant dense<0.000000e+00> : vector<8xf32>
      %501 = vector.multi_reduction <add>, %500, %cst_196 [0] : vector<8x8xf32> to vector<8xf32>
      %502 = vector.shape_cast %501 : vector<8xf32> to vector<1x8xf32>
      %c7_i32_197 = arith.constant 7 : i32
      %503 = vector.broadcast %c7_i32_197 : i32 to vector<8x1xi32>
      %504 = arith.cmpi eq, %160, %503 : vector<8x1xi32>
      %cst_198 = arith.constant 0.000000e+00 : f32
      %505 = vector.broadcast %cst_198 : f32 to vector<8x1xf32>
      %506 = arith.select %504, %496, %505 : vector<8x1xi1>, vector<8x1xf32>
      %cst_199 = arith.constant dense<0.000000e+00> : vector<1xf32>
      %507 = vector.multi_reduction <add>, %506, %cst_199 [0] : vector<8x1xf32> to vector<1xf32>
      %508 = vector.shape_cast %507 : vector<1xf32> to vector<1x1xf32>
      %c7_i32_200 = arith.constant 7 : i32
      %509 = vector.broadcast %c7_i32_200 : i32 to vector<1x8xi32>
      %510 = arith.cmpi eq, %158, %509 : vector<1x8xi32>
      %cst_201 = arith.constant 0.000000e+00 : f32
      %511 = vector.broadcast %cst_201 : f32 to vector<1x8xf32>
      %512 = arith.select %510, %502, %511 : vector<1x8xi1>, vector<1x8xf32>
      %cst_202 = arith.constant dense<0.000000e+00> : vector<1xf32>
      %513 = vector.multi_reduction <add>, %512, %cst_202 [1] : vector<1x8xf32> to vector<1xf32>
      %514 = vector.shape_cast %513 : vector<1xf32> to vector<1x1xf32>
      %cst_203 = arith.constant 1.000000e+00 : f32
      %515 = vector.broadcast %cst_203 : f32 to vector<1x1xf32>
      %516 = arith.divf %515, %514 : vector<1x1xf32>
      %517 = arith.mulf %508, %516 : vector<1x1xf32>
      %c7_i32_204 = arith.constant 7 : i32
      %518 = vector.broadcast %c7_i32_204 : i32 to vector<8x8xi32>
      %519 = arith.cmpi eq, %157, %518 : vector<8x8xi32>
      %cst_205 = arith.constant 0.000000e+00 : f32
      %520 = vector.broadcast %cst_205 : f32 to vector<8x8xf32>
      %521 = arith.select %519, %490, %520 : vector<8x8xi1>, vector<8x8xf32>
      %cst_206 = arith.constant dense<0.000000e+00> : vector<8xf32>
      %522 = vector.multi_reduction <add>, %521, %cst_206 [1] : vector<8x8xf32> to vector<8xf32>
      %523 = vector.shape_cast %522 : vector<8xf32> to vector<8x1xf32>
      %c7_i32_207 = arith.constant 7 : i32
      %524 = vector.broadcast %c7_i32_207 : i32 to vector<8x1xi32>
      %525 = arith.cmpi eq, %159, %524 : vector<8x1xi32>
      %cst_208 = arith.constant 0.000000e+00 : f32
      %526 = vector.broadcast %cst_208 : f32 to vector<8x1xf32>
      %527 = arith.select %525, %526, %523 : vector<8x1xi1>, vector<8x1xf32>
      %528 = vector.broadcast %517 : vector<1x1xf32> to vector<8x1xf32>
      %529 = arith.mulf %527, %528 : vector<8x1xf32>
      %530 = arith.subf %496, %529 : vector<8x1xf32>
      %531 = vector.shape_cast %517 : vector<1x1xf32> to vector<1x1xf32>
      %532 = vector.broadcast %531 : vector<1x1xf32> to vector<8x1xf32>
      %533 = arith.select %525, %532, %530 : vector<8x1xi1>, vector<8x1xf32>
      %c0_209 = arith.constant 0 : index
      %c0_210 = arith.constant 0 : index
      %534 = vector.load %arg19[%c0_209, %c0_210] : memref<8x1xf32, #tpu.memory_space<vmem>>, vector<8x1xf32>
      tpu.vector_store %arg19[%c0_209, %c0_210], %533 {strides = array<i32>} : memref<8x1xf32, #tpu.memory_space<vmem>>, vector<8x1xf32>,
    } else {
    }
    %c0 = arith.constant 0 : index
    %c0_1 = arith.constant 0 : index
    %c0_2 = arith.constant 0 : index
    %3 = vector.load %arg5[%c0, %c0_1, %c0_2] : memref<1x8x3xf32, #tpu.memory_space<vmem>>, vector<1x8x3xf32>
    %4 = vector.shape_cast %3 : vector<1x8x3xf32> to vector<8x3xf32>
    %c0_3 = arith.constant 0 : index
    %c0_4 = arith.constant 0 : index
    %5 = vector.load %arg17[%c0_3, %c0_4] : memref<1x32xf32, #tpu.memory_space<vmem>>, vector<1x32xf32>
    %c0_5 = arith.constant 0 : index
    %c0_6 = arith.constant 0 : index
    %6 = vector.load %arg8[%c0_5, %c0_6] : memref<3x32xf32, #tpu.memory_space<vmem>>, vector<3x32xf32>
    %cst = arith.constant dense<0.000000e+00> : vector<8x32xf32>
    %7 = tpu.matmul %4, %6, %cst {dimension_numbers = #tpu.dot_dimension_numbers<[1], [0], [0], [1], [0, 0, 1, 1], [], []>} : vector<8x3xf32>, vector<3x32xf32>, vector<8x32xf32> -> vector<8x32xf32>
    %8 = vector.broadcast %5 : vector<1x32xf32> to vector<8x32xf32>
    %9 = arith.addf %7, %8 : vector<8x32xf32>
    %cst_7 = arith.constant 0.000000e+00 : f32
    %10 = vector.broadcast %cst_7 : f32 to vector<8x32xf32>
    %11 = arith.maximumf %9, %10 : vector<8x32xf32>
    %c0_8 = arith.constant 0 : index
    %c0_9 = arith.constant 0 : index
    %12 = vector.load %arg11[%c0_8, %c0_9] : memref<32x16xf32, #tpu.memory_space<vmem>>, vector<32x16xf32>
    %cst_10 = arith.constant dense<0.000000e+00> : vector<8x16xf32>
    %13 = tpu.matmul %11, %12, %cst_10 {dimension_numbers = #tpu.dot_dimension_numbers<[1], [0], [0], [1], [0, 0, 1, 1], [], []>} : vector<8x32xf32>, vector<32x16xf32>, vector<8x16xf32> -> vector<8x16xf32>
    %c0_11 = arith.constant 0 : index
    %c0_12 = arith.constant 0 : index
    %14 = vector.load %arg12[%c0_11, %c0_12] : memref<1x16xf32, #tpu.memory_space<vmem>>, vector<1x16xf32>
    %15 = vector.broadcast %14 : vector<1x16xf32> to vector<8x16xf32>
    %16 = arith.addf %13, %15 : vector<8x16xf32>
    %c0_13 = arith.constant 0 : index
    %c0_14 = arith.constant 0 : index
    %17 = vector.load %arg18[%c0_13, %c0_14] : memref<8x16xf32, #tpu.memory_space<vmem>>, vector<8x16xf32>
    %c0_15 = arith.constant 0 : index
    %c0_16 = arith.constant 0 : index
    %c0_17 = arith.constant 0 : index
    %18 = vector.load %arg3[%c0_15, %c0_16, %c0_17] : memref<1x8x3xf32, #tpu.memory_space<vmem>>, vector<1x8x3xf32>
    %19 = vector.shape_cast %18 : vector<1x8x3xf32> to vector<8x3xf32>
    %20 = arith.mulf %17, %17 : vector<8x16xf32>
    %cst_18 = arith.constant dense<0.000000e+00> : vector<8xf32>
    %21 = vector.multi_reduction <add>, %20, %cst_18 [1] : vector<8x16xf32> to vector<8xf32>
    %22 = vector.shape_cast %21 : vector<8xf32> to vector<8x1xf32>
    %cst_19 = arith.constant 1.000000e+00 : f32
    %23 = vector.broadcast %cst_19 : f32 to vector<1x16xf32>
    %24 = arith.mulf %16, %16 : vector<8x16xf32>
    %cst_20 = arith.constant dense<0.000000e+00> : vector<1x8xf32>
    %25 = tpu.matmul %23, %24, %cst_20 {dimension_numbers = #tpu.dot_dimension_numbers<[1], [1], [0], [0], [0, 0, 1, 0], [], []>} : vector<1x16xf32>, vector<8x16xf32>, vector<1x8xf32> -> vector<1x8xf32>
    %cst_21 = arith.constant dense<0.000000e+00> : vector<8x8xf32>
    %26 = tpu.matmul %17, %16, %cst_21 {dimension_numbers = #tpu.dot_dimension_numbers<[1], [1], [0], [0], [0, 0, 1, 0], [], []>} : vector<8x16xf32>, vector<8x16xf32>, vector<8x8xf32> -> vector<8x8xf32>
    %27 = vector.broadcast %22 : vector<8x1xf32> to vector<8x8xf32>
    %28 = vector.broadcast %25 : vector<1x8xf32> to vector<8x8xf32>
    %29 = arith.addf %27, %28 : vector<8x8xf32>
    %cst_22 = arith.constant 2.000000e+00 : f32
    %30 = vector.broadcast %cst_22 : f32 to vector<8x8xf32>
    %31 = arith.mulf %30, %26 : vector<8x8xf32>
    %32 = arith.subf %29, %31 : vector<8x8xf32>
    %33 = arith.mulf %19, %19 : vector<8x3xf32>
    %cst_23 = arith.constant dense<0.000000e+00> : vector<8xf32>
    %34 = vector.multi_reduction <add>, %33, %cst_23 [1] : vector<8x3xf32> to vector<8xf32>
    %35 = vector.shape_cast %34 : vector<8xf32> to vector<8x1xf32>
    %cst_24 = arith.constant 1.000000e+00 : f32
    %36 = vector.broadcast %cst_24 : f32 to vector<1x3xf32>
    %37 = arith.mulf %4, %4 : vector<8x3xf32>
    %cst_25 = arith.constant dense<0.000000e+00> : vector<1x8xf32>
    %38 = tpu.matmul %36, %37, %cst_25 {dimension_numbers = #tpu.dot_dimension_numbers<[1], [1], [0], [0], [0, 0, 1, 0], [], []>} : vector<1x3xf32>, vector<8x3xf32>, vector<1x8xf32> -> vector<1x8xf32>
    %cst_26 = arith.constant dense<0.000000e+00> : vector<8x8xf32>
    %39 = tpu.matmul %19, %4, %cst_26 {dimension_numbers = #tpu.dot_dimension_numbers<[1], [1], [0], [0], [0, 0, 1, 0], [], []>} : vector<8x3xf32>, vector<8x3xf32>, vector<8x8xf32> -> vector<8x8xf32>
    %40 = vector.broadcast %35 : vector<8x1xf32> to vector<8x8xf32>
    %41 = vector.broadcast %38 : vector<1x8xf32> to vector<8x8xf32>
    %42 = arith.addf %40, %41 : vector<8x8xf32>
    %cst_27 = arith.constant 2.000000e+00 : f32
    %43 = vector.broadcast %cst_27 : f32 to vector<8x8xf32>
    %44 = arith.mulf %43, %39 : vector<8x8xf32>
    %45 = arith.subf %42, %44 : vector<8x8xf32>
    %46 = arith.addf %32, %45 : vector<8x8xf32>
    %cst_28 = arith.constant 0.000000e+00 : f32
    %47 = vector.broadcast %cst_28 : f32 to vector<8x8xf32>
    %48 = arith.maximumf %46, %47 : vector<8x8xf32>
    %cst_29 = arith.constant 0.000000e+00 : f32
    %49 = vector.broadcast %cst_29 : f32 to vector<8x8xf32>
    %50 = arith.subf %49, %48 : vector<8x8xf32>
    %cst_30 = arith.constant 2.000000e+00 : f32
    %51 = vector.broadcast %cst_30 : f32 to vector<8x8xf32>
    %52 = arith.mulf %50, %51 : vector<8x8xf32>
    %53 = math.exp %52 : vector<8x8xf32>
    %c0_31 = arith.constant 0 : index
    %c0_32 = arith.constant 0 : index
    %54 = vector.load %arg19[%c0_31, %c0_32] : memref<8x1xf32, #tpu.memory_space<vmem>>, vector<8x1xf32>
    %55 = vector.broadcast %54 : vector<8x1xf32> to vector<8x8xf32>
    %56 = arith.mulf %53, %55 : vector<8x8xf32>
    %cst_33 = arith.constant dense<0.000000e+00> : vector<8xf32>
    %57 = vector.multi_reduction <add>, %56, %cst_33 [0] : vector<8x8xf32> to vector<8xf32>
    %58 = vector.shape_cast %57 : vector<8xf32> to vector<1x8xf32>
    %c0_34 = arith.constant 0 : index
    %c0_35 = arith.constant 0 : index
    %c0_36 = arith.constant 0 : index
    %59 = vector.load %arg16[%c0_34, %c0_35, %c0_36] : memref<1x1x8xf32, #tpu.memory_space<vmem>>, vector<1x1x8xf32>
    %60 = vector.shape_cast %59 : vector<1x1x8xf32> to vector<1x8xf32>
    %61 = vector.shape_cast %58 : vector<1x8xf32> to vector<1x1x8xf32>
    tpu.vector_store %arg16[%c0_34, %c0_35, %c0_36], %61 {strides = array<i32>} : memref<1x1x8xf32, #tpu.memory_space<vmem>>, vector<1x1x8xf32>,
    return
  }
  func.func @transform_0(%arg0: i32, %arg1: i32) -> (i32, i32, i32) {
    %c0_i32 = arith.constant 0 : i32
    %c0_i32_0 = arith.constant 0 : i32
    %c0_i32_1 = arith.constant 0 : i32
    return %arg0, %c0_i32, %c0_i32_0 : i32, i32, i32
  }
  func.func @transform_1(%arg0: i32, %arg1: i32) -> (i32, i32, i32) {
    %c0_i32 = arith.constant 0 : i32
    %c0_i32_0 = arith.constant 0 : i32
    %c0_i32_1 = arith.constant 0 : i32
    return %arg0, %c0_i32, %c0_i32_0 : i32, i32, i32
  }
  func.func @transform_2(%arg0: i32, %arg1: i32) -> (i32, i32, i32) {
    %c0_i32 = arith.constant 0 : i32
    %c0_i32_0 = arith.constant 0 : i32
    %c0_i32_1 = arith.constant 0 : i32
    return %arg0, %c0_i32, %c0_i32_0 : i32, i32, i32
  }
  func.func @transform_3(%arg0: i32, %arg1: i32) -> (i32, i32, i32) {
    %c0_i32 = arith.constant 0 : i32
    %c0_i32_0 = arith.constant 0 : i32
    return %arg0, %arg1, %c0_i32 : i32, i32, i32
  }
  func.func @transform_4(%arg0: i32, %arg1: i32) -> (i32, i32) {
    %c0_i32 = arith.constant 0 : i32
    %c0_i32_0 = arith.constant 0 : i32
    %c0_i32_1 = arith.constant 0 : i32
    return %c0_i32, %c0_i32_0 : i32, i32
  }
  func.func @transform_5(%arg0: i32, %arg1: i32) -> (i32, i32) {
    %c0_i32 = arith.constant 0 : i32
    %c0_i32_0 = arith.constant 0 : i32
    %c0_i32_1 = arith.constant 0 : i32
    return %c0_i32, %c0_i32_0 : i32, i32
  }
  func.func @transform_6(%arg0: i32, %arg1: i32) -> (i32, i32) {
    %c0_i32 = arith.constant 0 : i32
    %c0_i32_0 = arith.constant 0 : i32
    %c0_i32_1 = arith.constant 0 : i32
    return %c0_i32, %c0_i32_0 : i32, i32
  }
  func.func @transform_7(%arg0: i32, %arg1: i32) -> (i32, i32) {
    %c0_i32 = arith.constant 0 : i32
    %c0_i32_0 = arith.constant 0 : i32
    %c0_i32_1 = arith.constant 0 : i32
    return %c0_i32, %c0_i32_0 : i32, i32
  }
  func.func @transform_8(%arg0: i32, %arg1: i32) -> (i32, i32) {
    %c0_i32 = arith.constant 0 : i32
    %c0_i32_0 = arith.constant 0 : i32
    %c0_i32_1 = arith.constant 0 : i32
    return %c0_i32, %c0_i32_0 : i32, i32
  }
  func.func @transform_9(%arg0: i32, %arg1: i32) -> (i32, i32) {
    %c0_i32 = arith.constant 0 : i32
    %c0_i32_0 = arith.constant 0 : i32
    %c0_i32_1 = arith.constant 0 : i32
    return %c0_i32, %c0_i32_0 : i32, i32
  }
  func.func @transform_10(%arg0: i32, %arg1: i32) -> (i32, i32) {
    %c0_i32 = arith.constant 0 : i32
    %c0_i32_0 = arith.constant 0 : i32
    %c0_i32_1 = arith.constant 0 : i32
    return %c0_i32, %c0_i32_0 : i32, i32
  }
  func.func @transform_11(%arg0: i32, %arg1: i32) -> (i32, i32) {
    %c0_i32 = arith.constant 0 : i32
    %c0_i32_0 = arith.constant 0 : i32
    %c0_i32_1 = arith.constant 0 : i32
    return %c0_i32, %c0_i32_0 : i32, i32
  }
  func.func @transform_12(%arg0: i32, %arg1: i32) -> (i32, i32) {
    %c0_i32 = arith.constant 0 : i32
    %c0_i32_0 = arith.constant 0 : i32
    %c0_i32_1 = arith.constant 0 : i32
    return %c0_i32, %c0_i32_0 : i32, i32
  }
  func.func @transform_13(%arg0: i32, %arg1: i32) -> (i32, i32) {
    %c0_i32 = arith.constant 0 : i32
    %c0_i32_0 = arith.constant 0 : i32
    %c0_i32_1 = arith.constant 0 : i32
    return %c0_i32, %c0_i32_0 : i32, i32
  }
  func.func @transform_14(%arg0: i32, %arg1: i32) -> (i32, i32, i32) {
    %c0_i32 = arith.constant 0 : i32
    %c0_i32_0 = arith.constant 0 : i32
    return %arg0, %c0_i32, %arg1 : i32, i32, i32
  }
}

</mosaic_0001>

<bundles_post_ra>
// kernel: tpu_custom_call.1
= control target key start
LH: loop header
LB: loop body
LE: loop exit
PB: predicated region body
PF: predicated region fallthrough
CT: control target
= control target key end

     0   :  { %s3255_s0 = inlined_call_operand.vmem [shape: f32[2,8,4], index: 0, kind: input, shape index: {}]   ;;  %s3256_s1 = inlined_call_operand.vmem [shape: f32[2,8,3], index: 1, kind: input, shape index: {}]   ;;  %s3257_s2 = inlined_call_operand.vmem [shape: f32[2,8,1], index: 2, kind: input, shape index: {}]   ;;  %s3258_s3 = inlined_call_operand.vmem [shape: f32[2,8,3], index: 3, kind: input, shape index: {}]   ;;  %s3259_s4 = inlined_call_operand.vmem [shape: f32[4,32], index: 4, kind: input, shape index: {}]   ;;  %s3260_s5 = inlined_call_operand.vmem [shape: f32[1,32], index: 5, kind: input, shape index: {}]   ;;  %s3261_s6 = inlined_call_operand.vmem [shape: f32[3,32], index: 6, kind: input, shape index: {}]   ;;  %s3262_s7 = inlined_call_operand.vmem [shape: f32[32,32], index: 7, kind: input, shape index: {}]   ;;  %s3263_s8 = inlined_call_operand.vmem [shape: f32[1,32], index: 8, kind: input, shape index: {}]   ;;  %s3264_s9 = inlined_call_operand.vmem [shape: f32[32,16], index: 9, kind: input, shape index: {}]   ;;  %s3265_s10 = inlined_call_operand.vmem [shape: f32[1,16], index: 10, kind: input, shape index: {}]   ;;  %s3266_s11 = inlined_call_operand.vmem [shape: f32[16,1], index: 11, kind: input, shape index: {}]   ;;  %s3267_s12 = inlined_call_operand.vmem [shape: f32[3,1], index: 12, kind: input, shape index: {}]   ;;  %s3268_s13 = inlined_call_operand.<no memory space> [shape: f32[1,1], index: 13, kind: input, shape index: {}]   ;;  %s3269_s14 = inlined_call_operand.hbm [shape: f32[2,1,8], index: 14, kind: output, shape index: {}]  }
   0x1   :  { %3271 = sst [smem:[#allocation10_spill]] %s3255_s0  ;;  %v19_v0 = vstv %s3268_s13 }
   0x2   :  { %3272 = sst [smem:[#allocation11_spill]] %s3256_s1  ;;  %20 = vst [vmem:[#allocation5] sm:$0x1] %v19_v0 }
   0x3   :  { %3273 = sst [smem:[#allocation12_spill]] %s3259_s4 }
   0x4   :  { %21 = vsyncpa [#allocation7], 0 }
   0x5   :  { %23 = vsyncpa [#allocation7 + $0x1], 0  ;;  %s2804_s15 = smov 0   ;;  %s2806_s16 = smov 0  }
   0x6   :  { %s2808_s17 = smov 0   ;;  %s2810_s18 = smov 0  }
   0x7   :  { %s2812_s19 = smov 0   ;;  %s2814_s20 = smov 0  }
   0x8 LB: > { %s2342_s13 = sadd.s32 4294967295, %s2718_s20   ;;  %s2343_s21 = sadd.s32 4294967294, %s2718_s20   ;;  %s2718_s20 = sphi %s2814_s20, %s29_s20   ;;  %s2714_s19 = sphi %s2812_s19, %s3285_s19   ;;  %s2710_s18 = sphi %s2810_s18, %s3284_s18   ;;  %s2706_s17 = sphi %s2808_s17, %s3283_s17   ;;  %s2702_s16 = sphi %s2806_s16, %s3282_s16   ;;  %s2698_s15 = sphi %s2804_s15, %s3281_s15  }
   0x9   : > { %s41_s22 = sadd.s32 1, %s2714_s19  ;;  %s366_s23 = sadd.s32 1, %s2706_s17 }
   0xa   : > { %p43_p0 = scmp.ge.s32.totalorder %s41_s22, 2  ;;  %p376_p1 = scmp.ne.s32.totalorder %s2706_s17, %s2702_s16 }
   0xb   : > { %p377_p2 = scmp.eq.s32.totalorder %s2342_s13, 1  ;;  %p382_p3 = scmp.ne.s32.totalorder %s2702_s16, %s2698_s15 }
   0xc   : > { %s3287_s22 = smov (%p43_p0, %s41_s22), 0  ;;  %p383_p5 = scmp.eq.s32.totalorder %s2343_s21, 1 }
   0xd   : > { %3274 = sst [smem:[#allocation9_spill]] %s3287_s22  ;;  %p2844_p4 = por %p377_p2, %p376_p1 }
   0xe   : > { %s361_s25 = ssub.s32 %s2714_s19, %s3287_s22  ;;  %p2346_p6 = scmp.ge.s32.totalorder %s2718_s20, 1 }
   0xf   : > { %p364_p7 = scmp.eq.s32.totalorder %s361_s25, 0  ;;  %p2851_p8 = por %p383_p5, %p382_p3 }
  0x10   : > { %p462_p9 = scmp.lt.s32.totalorder %s2718_s20, 3 }
  0x11   : > { %s2857_s27 = scalar_select %p364_p7, %s2706_s17, %s366_s23  }
  0x12   : > { %p463_p10 = pnand %p2346_p6, %p462_p9 }
  0x13   : > { %s3277_s4 = sld [smem:[#allocation12_spill]] (!%p463_p10)  ;;  %vm559_vm0 = vcmask (!%p463_p10), 1043456   ;;  %p521_p11 = scmp.lt.s32.totalorder (!%p463_p10), %s2710_s18, 1  ;;  %v2720_v2 = vmov (!%p463_p10), 0.0   ;;  %vm2721_vm1 = vmmov (!%p463_p10), 0   ;;  %vm555_vm2 = vcmask (!%p463_p10), 31744  }
  0x14   : > { %466 = sbr.rel (%p463_p10) target bundleno = 2657 (0xa61), region = 76  ;;  %2431 = vmatprep.subr.mxu0 (!%p463_p10), %v2720_v2  ;;  %2433 = vmatprep.mubr.msk.f32.mxu0 (!%p463_p10), %vm2721_vm1, %v2720_v2  ;;  %s3278_s0 = sld [smem:[#allocation10_spill]] (!%p463_p10)  ;;  %v644_v4 = vld [vmem:[%s3262_s7] sm:$0xff] (!%p463_p10)  ;;  %v645_v5 = vld [vmem:[%s3262_s7 + $0x8] sm:$0xff] (!%p463_p10)  ;;  %v2722_v7 = vmov (!%p463_p10), 0.0|0.0   ;;  %v646_v8 = vld [vmem:[%s3262_s7 + $0x10] sm:$0xff] (!%p463_p10)  ;;  %v725_v38 = vlaneseq (!%p463_p10) }
  0x15   : > { %2444 = vmatprep.mubr.msk.f32.mxu1 (!%p463_p10), %vm2721_vm1, %v2720_v2  ;;  %v2532_v6 = vpack.c.bf16 (!%p463_p10), %v645_v5, %v644_v4  ;;  %2531 = vmatprep.subr.bf16.mxu1 (!%p463_p10), %v2722_v7  ;;  %v647_v9 = vld [vmem:[%s3262_s7 + $0x18] sm:$0xff] (!%p463_p10)  ;;  %v724_v11 = vld [vmem:[%s3261_s6] sm:$0x7] (!%p463_p10)  ;;  %vm733_vm3 = vcmask (!%p463_p10), 1042432   ;;  %s3279_s1 = sld [smem:[#allocation11_spill]] (!%p463_p10)  ;;  %vm729_vm4 = vcmask (!%p463_p10), 23552  }
  0x16   : > { %v2535_v10 = vpack.c.bf16 (!%p463_p10), %v647_v9, %v646_v8  ;;  %v2351_v13 = vld [vmem:[%s3260_s5] ss:$0 sm:$0xff] (!%p463_p10)  ;;  %vm634_vm5 = vcmask (!%p463_p10), 261120   ;;  %v809_v27 = vld [vmem:[%s3264_s9 + $0x8] sm:$0xff] (!%p463_p10)  ;;  %v810_v30 = vld [vmem:[%s3264_s9 + $0x10] sm:$0xff] (!%p463_p10)  ;;  %v2952_v39 = vshrl.u32 (!%p463_p10), %v725_v38, 7 }
  0x17   : > { %2533 = vmatpush3.bf16.msra.mxu1 (!%p463_p10), %v2532_v6  ;;  %v808_v26 = vld [vmem:[%s3264_s9] sm:$0xff] (!%p463_p10)  ;;  %v811_v31 = vld [vmem:[%s3264_s9 + $0x18] sm:$0xff] (!%p463_p10)  ;;  %v895_v36 = vld [vmem:[%s3266_s11 + $0x8] sm:$0xff] (!%p463_p10)  ;;  %vm722_vm6 = vcmask (!%p463_p10), 253952   ;;  %vm892_vm7 = vcmask (!%p463_p10), 130048   ;;  %v2723_v55 = vmov (!%p463_p10), 1.0  }
  0x18   : > { %2534 = vmatprep.subr.bf16.mxu1 (!%p463_p10), %v2722_v7  ;;  %v2921_v28 = vpack.c.bf16 (!%p463_p10), %v809_v27, %v808_v26  ;;  %v2931_v33 = vpack.c.bf16 (!%p463_p10), %v811_v31, %v810_v30  ;;  %v896_v34 = vld [vmem:[%s3267_s12] sm:$0x7] (!%p463_p10)  ;;  %v2958_v41 = vsub.s32 (!%p463_p10), 0, %v2952_v39  ;;  %v2724_v61 = vmov (!%p463_p10), 0   ;;  %v2362_v63 = vld [vmem:[#allocation5] ss:$0 sm:$0xff] (!%p463_p10) }
  0x19   : > { %v547_v1 = vld [vmem:[%s3277_s4] sm:$0xf] (!%p463_p10)  ;;  %2612 = vset.pattern.permute.xlu1 (!%p463_p10), %v2724_v61  ;;  %2613 = vset.pattern.permute.xlu0 (!%p463_p10), %v2724_v61  ;;  %vm1393_vm9 = vcmp.eq.s32.totalorder (!%p463_p10), %v2952_v39, 0  ;;  %vm1395_vm11 = vcmask (!%p463_p10), 64512   ;;  %vm1404_vm12 = vcmask (!%p463_p10), 7168   ;;  %vm1434_vm13 = vcmp.eq.s32.totalorder (!%p463_p10), %v2952_v39, 1 }
  0x1a   : > { %2432 = vmatpush3.msk.msra.mxu0 (!%p463_p10), %vm559_vm0, %v547_v1  ;;  %v894_v35 = vld [vmem:[%s3266_s11] sm:$0xff] (!%p463_p10)  ;;  %vm1473_vm15 = vcmp.eq.s32.totalorder (!%p463_p10), %v2952_v39, 2  ;;  %s2386_s21 = sshll.u32 (!%p463_p10), %s2710_s18, 4 }
  0x1b   : > { %s522_s30 = scalar_select %p521_p11, %s2710_s18, 1  ;;  %2447 = vmatprep.subr.mxu0 %v2720_v2  ;;  %2536 = vmatpush3.bf16.msra.mxu1 %v2535_v10  ;;  %v2544_v37 = vpack.c.bf16 %v895_v36, %v894_v35  ;;  %v648_v40 = vld [vmem:[%s3263_s8] sm:$0x1] }
  0x1c   : > { %2463 = vmatprep.subr.mxu1 %v2720_v2  ;;  %v2967_v48 = vld [vmem:[%s3265_s10] ss:$0 sm:$0xff]  ;;  %s2725_s18 = smov [#allocation6]  }
  0x1d   : > { %s2870_s13 = sshll.u32 %s522_s30, 3  ;;  %v1704_v57 = vld [vmem:[%s3261_s6] sm:$0x7] }
  0x1e   : > { %s524_s25 = scalar_lea.vmem %s3278_s0, %s2870_s13  ;;  %s528_s0 = scalar_lea.vmem %s3279_s1, %s2870_s13 }
  0x1f   : > { %v544_v3 = vld [vmem:[%s524_s25] sm:$0xff]  ;;  %s539_s22 = scalar_lea.vmem %s3258_s3, %s2870_s13  ;;  %s532_s30 = scalar_lea.vmem %s3257_s2, %s2870_s13 }
  0x20   : > { %2434 = vmatmul.mubr.msk.f32.vlgmr.msra.gmra.mrb[0].mxu0 %vm555_vm2, %v544_v3  ;;  %v2901_v12 = vld [vmem:[%s528_s0] sm:$0xff]  ;;  %s519_s13 = sand.u32 1, %s2702_s16  }
  0x21   : > { %2449 = vmatprep.mubr.msk.f32.mxu0 %vm2721_vm1, %v2720_v2  ;;  %2448 = vmatpush3.msk.msra.mxu0 %vm733_vm3, %v724_v11  ;;  %v1215_v54 = vmul.f32 %v2901_v12, %v2901_v12  ;;  %v3011_v58 = vld [vmem:[%s539_s22] sm:$0xff]  ;;  %s520_s0 = scalar_lea.vmem [#allocation6], %s519_s13  ;;  %s3208_s22 = scalar_lea.hbm %s3269_s14, %s2386_s21 }
  0x22   : > { %2537 = vmatprep.subr.bf16.mxu0 %v2722_v7  ;;  %s2239_s23 = sshll.u32 %s520_s0, 4  ;;  %s2226_s28 = scalar_lea.sflag [#allocation7], %s519_s13  ;;  %s3210_s23 = int_to_ptr.vmem [resolvable:$true] %s2239_s23 }
  0x23   : > { %v2987_v56 = vsel %vm729_vm4, %v1215_v54, 0.0  ;;  %s2640_s29 = scalar_lea.vmem %s3210_s23, 16 }
  0x24   : > { %2450 = vmatmul.mubr.msk.f32.vlgmr.msra.gmra.mrb[2].mxu0 %vm729_vm4, %v2901_v12  ;;  %p2641_p12 = scmp.ne.s32.totalorder %s3210_s23, %s2640_s29 }
  0x25   : > { %2460 = vmatprep.mubr.msk.f32.mxu0 %vm2721_vm1, %v2720_v2  ;;  %2539 = vmatpush3.bf16.msra.mxu0 %v2921_v28 }
  0x26   : > { %2540 = vmatprep.subr.bf16.mxu0 %v2722_v7  ;;  %p2642_p13 = pnand %p2641_p12, %p2844_p4 }
  0x28   : > { %p2643_p0 = pneg %p2642_p13 }
  0x29   : > { %2542 = vmatpush3.bf16.msra.mxu0 %v2931_v33 }
  0x2a   : > { %2475 = vmatprep.subr.mxu0 %v2720_v2 }
  0xf3   : > { %v629_v14 = vpop.f32.mrb[0].mxu0 }
  0xf4   : > { %v630_v15 = vadd.f32 %v2351_v13, %v629_v14  ;;  %v2435_v16 = vpop.f32.mrb[1].mxu0 }
  0xf6   : > { %v633_v17 = vmax.f32 %v630_v15, 0.0 }
  0xf7   : > { %v803_v29 = vpop.f32.mrb[2].mxu0 }
  0xf8   : > { %v635_v18 = vsel %vm634_vm5, %v633_v17, 0.0  ;;  %v2451_v32 = vpop.f32.mrb[3].mxu0 }
  0xf9   : > { %v636_v19 = vrot.slane %v635_v18, 4 }
  0xfb   : > { %v637_v20 = vadd.f32 %v636_v19, %v635_v18 }
  0xfd   : > { %v638_v21 = vrot.slane %v637_v20, 2 }
  0xff   : > { %v639_v22 = vadd.f32 %v638_v21, %v637_v20 }
 0x101   : > { %v640_v23 = vrot.slane %v639_v22, 1 }
 0x103   : > { %v641_v24 = vadd.f32 %v640_v23, %v639_v22 }
 0x105   : > { %v643_v25 = vmul.f32 0.125, %v641_v24 }
 0x107   : > { %2445 = vmatmul.mubr.msk.f32.vlgmr.msra.gmra.mrb[0].mxu1 %vm634_vm5, %v643_v25 }
 0x108   : > { %2465 = vmatprep.mubr.msk.f32.mxu1 %vm2721_vm1, %v2720_v2  ;;  %2464 = vmatpush3.msk.msra.mxu1 %vm733_vm3, %v896_v34 }
 0x109   : > { %2543 = vmatprep.subr.bf16.mxu1 %v2722_v7 }
 0x10b   : > { %2466 = vmatmul.mubr.msk.f32.vlgmr.msra.gmra.mrb[2].mxu1 %vm729_vm4, %v2901_v12 }
 0x10c   : > { %2545 = vmatpush3.bf16.msra.mxu1 %v2544_v37  ;;  %2472 = vmatprep.mubr.msk.f32.mxu1 %vm2721_vm1, %v2720_v2 }
 0x10d   : > { %2480 = vmatprep.subr.mxu1 %v2720_v2 }
 0x1da   : > { %v718_v42 = vpop.f32.mrb[0].mxu1 }
 0x1db   : > { %v719_v43 = vadd.f32 %v718_v42, %v648_v40  ;;  %v2446_v44 = vpop.f32.mrb[1].mxu1  ;;  %v3035_v42 = vand.u32 127, %v725_v38 }
 0x1dd   : > { %723 = vst.msk [vmem:[#allocation2] sm:$0x1] %vm722_vm6, %v719_v43  ;;  %v728_v45 = vrot.slane %v719_v43, %v2958_v41  ;;  %vm1381_vm8 = vcmp.eq.s32.totalorder %v2952_v39, %v3035_v42  ;;  %vm1412_vm10 = vcmp.eq.s32.totalorder %v3035_v42, 0  ;;  %vm1451_vm14 = vcmp.eq.s32.totalorder %v3035_v42, 1 }
 0x1de   : > { %v966_v59 = vpop.f32.mrb[2].mxu1  ;;  %v2372_v44 = vsel %vm1381_vm8, 1.0, %v2720_v2  ;;  %vm1490_vm0 = vcmp.eq.s32.totalorder %v3035_v42, 2  ;;  %vm1529_vm2 = vcmp.eq.s32.totalorder %v3035_v42, 3  ;;  %vm1607_vm6 = vcmp.eq.s32.totalorder %v3035_v42, 5 }
 0x1df   : > { %v804_v46 = vadd.f32 %v803_v29, %v728_v45  ;;  %v2467_v60 = vpop.f32.mrb[3].mxu1  ;;  %v1384_v45 = vmul.f32 0.01, %v2372_v44  ;;  %vm1629_vm8 = vcmp.eq.s32.totalorder %v2952_v39, 6 }
 0x1e1   : > { %v807_v47 = vmax.f32 %v804_v46, 0.0 }
 0x1e3   : > { %2461 = vmatmul.mubr.msk.f32.vlgmr.msra.gmra.mrb[4].mxu0 %vm634_vm5, %v807_v47 }
 0x1e4   : > { %2477 = vmatprep.mubr.msk.f32.mxu0 %vm2721_vm1, %v2720_v2  ;;  %v2373_v23 = vld [vmem:[#allocation2] ss:$0 sm:$0xff] }
 0x2b6   : > { %v888_v49 = vpop.f32.mrb[4].mxu0 }
 0x2b7   : > { %v889_v50 = vadd.f32 %v2967_v48, %v888_v49  ;;  %v2462_v51 = vpop.f32.mrb[5].mxu0 }
 0x2b9   : > { %893 = vst.msk [vmem:[#allocation3] sm:$0xff] %vm892_vm7, %v889_v50  ;;  %2473 = vmatmul.mubr.msk.f32.vlgmr.msra.gmra.mrb[4].mxu1 %vm892_vm7, %v889_v50  ;;  %v1058_v52 = vmul.f32 %v889_v50, %v889_v50 }
 0x2ba   : > { %2481 = vmatpush3.xpose.msk.msra.mxu1 %vm892_vm7, %v889_v50  ;;  %2482 = vmatprep.mubr.msk.f32.mxu1 %vm2721_vm1, %v2720_v2 }
 0x2bb   : > { %2476 = vmatpush3.xpose.msk.msra.mxu0 %vm892_vm7, %v1058_v52  ;;  %v1059_v53 = vsel %vm892_vm7, %v1058_v52, 0.0  ;;  %2490 = vmatprep.subr.mxu1 %v2720_v2 }
 0x2bc   : > { %1060 = vadd.xlane.f32.xlu0 %v1059_v53  ;;  %2485 = vmatprep.subr.mxu0 %v2720_v2 }
 0x2bd   : > { %2483 = vmatmul.mubr.msk.f32.vlgmr.msra.gmra.mrb[6].mxu1 %vm892_vm7, %v889_v50 }
 0x2be   : > { %2478 = vmatmul.mubr.msk.f32.vlgmr.msra.gmra.mrb[6].mxu0 %vm892_vm7, %v2723_v55  ;;  %2491 = vmatpush3.xpose.msk.msra.mxu1 %vm729_vm4, %v2901_v12 }
 0x2bf   : > { %2486 = vmatpush3.xpose.msk.msra.mxu0 %vm729_vm4, %v1215_v54  ;;  %2487 = vmatprep.mubr.msk.f32.mxu0 %vm2721_vm1, %v2720_v2 }
 0x2c0   : > { %2492 = vmatprep.mubr.msk.f32.mxu1 %vm2721_vm1, %v2720_v2  ;;  %2495 = vmatprep.subr.mxu0 %v2720_v2 }
 0x2c1   : > { %2493 = vmatmul.mubr.msk.f32.vlgmr.msra.gmra.mrb[8].mxu1 %vm729_vm4, %v2901_v12  ;;  %1217 = vadd.xlane.f32.xlu0 %v2987_v56 }
 0x2c2   : > { %2488 = vmatmul.mubr.msk.f32.vlgmr.msra.gmra.mrb[8].mxu0 %vm729_vm4, %v2723_v55  ;;  %2546 = vmatprep.subr.bf16.mxu1 %v2722_v7 }
 0x2c3   : > { %2496 = vmatpush3.msk.msra.mxu0 %vm733_vm3, %v1704_v57  ;;  %2497 = vmatprep.mubr.msk.f32.mxu0 %vm2721_vm1, %v2720_v2  ;;  %vm1551_vm3 = vcmp.eq.s32.totalorder %v2952_v39, 4 }
 0x2c4   : > { %2548 = vmatpush3.bf16.msra.mxu1 %v2921_v28  ;;  %2508 = vmatprep.mubr.msk.f32.mxu1 %vm2721_vm1, %v2720_v2  ;;  %v2046_v28 = vmul.f32 %v3011_v58, %v3011_v58 }
 0x2c5   : > { %2549 = vmatprep.subr.bf16.mxu1 %v2722_v7  ;;  %2511 = vmatprep.subr.mxu0 %v2720_v2 }
 0x2c6   : > { %2498 = vmatmul.mubr.msk.f32.vlgmr.msra.gmra.mrb[10].mxu0 %vm729_vm4, %v3011_v58 }
 0x2c7   : > { %2513 = vmatprep.mubr.msk.f32.mxu0 %vm2721_vm1, %v2720_v2 }
 0x2c8   : > { %2551 = vmatpush3.bf16.msra.mxu1 %v2931_v33 }
 0x2c9   : > { %2521 = vmatprep.subr.mxu1 %v2720_v2 }
 0x349   : > { %v1061_v4 = vpop.xlane.xlu0 %1060 }
 0x34e   : > { %v1218_v14 = vpop.xlane.xlu0 %1217 }
 0x38c   : > { %v1039_v62 = vpop.f32.mrb[4].mxu1 }
 0x38d   : > { %v1040_v0 = vadd.f32 %v1039_v62, %v966_v59  ;;  %v2474_v1 = vpop.f32.mrb[5].mxu1 }
 0x38f   : > { %v1050_v3 = vadd.f32 %v2362_v63, %v1040_v0 }
 0x390   : > { %v1204_v5 = vpop.f32.mrb[6].mxu1 }
 0x391   : > { %v2363_v6 = vmul.f32 -1.442695, %v1050_v3  ;;  %v1134_v7 = vpop.f32.mrb[6].mxu0  ;;  %v2484_v8 = vpop.f32.mrb[7].mxu1  ;;  %v1213_v11 = vmul.f32 2.0, %v1204_v5 }
 0x392   : > { %v1211_v9 = vrot.slane %v1134_v7, %v2958_v41  ;;  %v2479_v10 = vpop.f32.mrb[7].mxu0 }
 0x393   : > { %2614 = vpow2.f32 %v2363_v6  ;;  %v3056_v6 = vld [vmem:[#allocation3] sm:$0xff] }
 0x394   : > { %v1212_v13 = vadd.f32 %v1211_v9, %v1061_v4  ;;  %v1360_v15 = vpop.f32.mrb[8].mxu1 }
 0x395   : > { %v1290_v16 = vpop.f32.mrb[8].mxu0  ;;  %v2494_v17 = vpop.f32.mrb[9].mxu1  ;;  %v1369_v20 = vmul.f32 2.0, %v1360_v15 }
 0x396   : > { %v1214_v18 = vsub.f32 %v1212_v13, %v1213_v11  ;;  %v1367_v19 = vrot.slane %v1290_v16, %v2958_v41  ;;  %v2489_v21 = vpop.f32.mrb[9].mxu0 }
 0x398   : > { %v1368_v22 = vadd.f32 %v1367_v19, %v1218_v14 }
 0x399   : > { %v1785_v24 = vpop.f32.mrb[10].mxu0 }
 0x39a   : > { %v1370_v25 = vsub.f32 %v1368_v22, %v1369_v20  ;;  %v1786_v26 = vadd.f32 %v2373_v23, %v1785_v24  ;;  %v2499_v27 = vpop.f32.mrb[11].mxu0 }
 0x39c   : > { %v1371_v29 = vadd.f32 %v1370_v25, %v1214_v18  ;;  %v1789_v30 = vmax.f32 %v1786_v26, 0.0 }
 0x39d   : > { %v2615_v31 = vpop.eup %2614 }
 0x39e   : > { %v1054_v32 = vadd.f32 1.0, %v2615_v31  ;;  %2509 = vmatmul.mubr.msk.f32.vlgmr.msra.gmra.mrb[10].mxu1 %vm634_vm5, %v1789_v30  ;;  %v1372_v36 = vmax.f32 %v1371_v29, 0.0  ;;  %vm1590_vm5 = vcmp.eq.s32.totalorder %v2952_v39, 5 }
 0x39f   : > { %2522 = vmatpush3.xpose.msk.msra.mxu1 %vm729_vm4, %v2046_v28  ;;  %2523 = vmatprep.mubr.msk.f32.mxu1 %vm2721_vm1, %v2720_v2 }
 0x3a0   : > { %2616 = vrcp.f32 %v1054_v32  ;;  %v1373_v37 = vsub.f32 0.0, %v1372_v36 }
 0x3a2   : > { %2524 = vmatmul.mubr.msk.f32.vlgmr.msra.gmra.mrb[12].mxu1 %vm729_vm4, %v2723_v55  ;;  %v1374_v40 = vmul.f32 2.0, %v1373_v37 }
 0x3a4   : > { %v1375_v43 = vmul.f32 1.442695, %v1374_v40 }
 0x3aa   : > { %v2617_v33 = vpop.eup %2616 }
 0x3ab   : > { %v1057_v34 = vmax.f32 %v2617_v33, 1e-06 }
 0x3ad   : > { %2618 = vrcp.f32 %v1057_v34 }
 0x3ae   : > { %2620 = vpow2.f32 %v1375_v43 }
 0x3b7   : > { %v2619_v35 = vpop.eup %2618 }
 0x3b8   : > { %1388 = vperm.xlu1 %2612, %v2619_v35   ;;  %v2621_v49 = vpop.eup %2620 }
 0x437   : > { %v1389_v46 = vpop.permute.xlu1 %1388 }
 0x438   : > { %v1391_v47 = vmul.f32 %v1389_v46, %v1384_v45 }
 0x43a   : > { %v1392_v50 = vadd.f32 %v2621_v49, %v1391_v47 }
 0x43c   : > { %v1394_v38 = vsel %vm1393_vm9, %v1392_v50, 0.0  ;;  %v1421_v51 = vsel %vm1412_vm10, %v1392_v50, 0.0 }
 0x43d   : > { %v1396_v52 = vsel %vm1395_vm11, %v1394_v38, 0.0  ;;  %v1422_v53 = vsel %vm1395_vm11, %v1421_v51, 0.0 }
 0x43e   : > { %v1397_v54 = vrot.slane %v1396_v52, 4  ;;  %1423 = vadd.xlane.f32.xlu0 %v1422_v53 }
 0x440   : > { %v1398_v57 = vadd.f32 %v1397_v54, %v1396_v52 }
 0x442   : > { %v1399_v59 = vrot.slane %v1398_v57, 2 }
 0x444   : > { %v1400_v60 = vadd.f32 %v1399_v59, %v1398_v57 }
 0x446   : > { %v1401_v61 = vrot.slane %v1400_v60, 1 }
 0x448   : > { %v1402_v62 = vadd.f32 %v1401_v61, %v1400_v60 }
 0x44a   : > { %v1413_v63 = vsel %vm1412_vm10, %v1402_v62, 0.0  ;;  %vm1668_vm10 = vcmp.eq.s32.totalorder %v2952_v39, 7 }
 0x44b   : > { %v1414_v0 = vsel %vm1395_vm11, %v1413_v63, 0.0 }
 0x44c   : > { %1415 = vadd.xlane.f32.xlu1 %v1414_v0 }
 0x471   : > { %v1871_v1 = vpop.f32.mrb[10].mxu1 }
 0x472   : > { %v1872_v3 = vadd.f32 %v2967_v48, %v1871_v1  ;;  %v2510_v4 = vpop.f32.mrb[11].mxu1  ;;  %v546_v48 = vld [vmem:[%s532_s30] sm:$0xff]  ;;  %s2644_s30 = sshll.u32 %s2725_s18, 4  ;;  %s2645_s30 = int_to_ptr.vmem [resolvable:$false] %s2644_s30 }
 0x473   : > { %s2646_s1 = scalar_lea.vmem %s2645_s30, 32  ;;  %p2647_p1 = scmp.lt.s32.totalorder %s3210_s23, %s2645_s30 }
 0x474   : > { %v1882_v5 = vmul.f32 %v1872_v3, %v1872_v3  ;;  %p2648_p2 = scmp.lt.s32.totalorder %s2646_s1, %s2640_s29 }
 0x476   : > { %2512 = vmatpush3.xpose.msk.msra.mxu0 %vm892_vm7, %v1882_v5  ;;  %p2649_p3 = por %p2648_p2, %p2647_p1 }
 0x477   : > { %2516 = vmatprep.subr.mxu0 %v2720_v2 }
 0x478   : > { %p2650_p5 = pnand %p2649_p3, %p2643_p0 }
 0x479   : > { %2514 = vmatmul.mubr.msk.f32.vlgmr.msra.gmra.mrb[12].mxu0 %vm892_vm7, %v2723_v55  ;;  %v1403_v55 = vsel %vm1393_vm9, %v546_v48, 0.0 }
 0x47a   : > { %2517 = vmatpush3.xpose.msk.msra.mxu0 %vm892_vm7, %v1872_v3  ;;  %2518 = vmatprep.mubr.msk.f32.mxu0 %vm2721_vm1, %v2720_v2  ;;  %v1405_v7 = vsel %vm1404_vm12, %v1403_v55, 0.0 }
 0x47b   : > { %2526 = vmatprep.subr.mxu0 %v2720_v2  ;;  %v1406_v8 = vrot.slane %v1405_v7, 4 }
 0x47d   : > { %2519 = vmatmul.mubr.msk.f32.vlgmr.msra.gmra.mrb[14].mxu0 %vm892_vm7, %v3056_v6  ;;  %v1407_v9 = vadd.f32 %v1406_v8, %v1405_v7 }
 0x47e   : > { %2527 = vmatpush3.xpose.msk.msra.mxu0 %vm729_vm4, %v3011_v58  ;;  %2528 = vmatprep.mubr.msk.f32.mxu0 %vm2721_vm1, %v2720_v2  ;;  %vm1512_vm1 = vcmp.eq.s32.totalorder %v2952_v39, 3 }
 0x47f   : > { %v1408_v58 = vrot.slane %v1407_v9, 2 }
 0x481   : > { %2529 = vmatmul.mubr.msk.f32.vlgmr.msra.gmra.mrb[16].mxu0 %vm729_vm4, %v2901_v12  ;;  %v1409_v11 = vadd.f32 %v1408_v58, %v1407_v9  ;;  %vm1568_vm4 = vcmp.eq.s32.totalorder %v3035_v42, 4 }
 0x483   : > { %v1410_v2 = vrot.slane %v1409_v11, 1 }
 0x485   : > { %v1411_v13 = vadd.f32 %v1410_v2, %v1409_v11 }
 0x4cb   : > { %v1424_v12 = vpop.xlane.xlu0 %1423 }
 0x4cc   : > { %v1425_v17 = vsel %vm1393_vm9, 0.0, %v1424_v12 }
 0x4d9   : > { %v1416_v10 = vpop.xlane.xlu1 %1415 }
 0x4da   : > { %2622 = vrcp.f32 %v1416_v10 }
 0x4e4   : > { %v2623_v14 = vpop.eup %2622 }
 0x4e5   : > { %v1419_v15 = vmul.f32 %v2623_v14, %v1402_v62  ;;  %v1420_v16 = vmul.f32 %v2623_v14, %v1411_v13 }
 0x4e7   : > { %v1426_v18 = vmul.f32 %v1425_v17, %v1419_v15  ;;  %v1431_v19 = vmul.f32 %v1425_v17, %v1420_v16 }
 0x4e9   : > { %v1427_v20 = vsub.f32 %v1392_v50, %v1426_v18  ;;  %v1432_v21 = vsub.f32 %v546_v48, %v1431_v19 }
 0x4eb   : > { %v1430_v22 = vsel %vm1393_vm9, %v1419_v15, %v1427_v20  ;;  %v1433_v23 = vsel %vm1393_vm9, %v1420_v16, %v1432_v21  ;;  %vm1646_vm9 = vcmp.eq.s32.totalorder %v3035_v42, 6 }
 0x4ec   : > { %v1435_v24 = vsel %vm1434_vm13, %v1430_v22, 0.0  ;;  %v1460_v34 = vsel %vm1451_vm14, %v1430_v22, 0.0  ;;  %v1443_v44 = vsel %vm1434_vm13, %v1433_v23, 0.0 }
 0x4ed   : > { %v1436_v25 = vsel %vm1395_vm11, %v1435_v24, 0.0  ;;  %v1461_v35 = vsel %vm1395_vm11, %v1460_v34, 0.0  ;;  %v1444_v45 = vsel %vm1404_vm12, %v1443_v44, 0.0 }
 0x4ee   : > { %v1437_v26 = vrot.slane %v1436_v25, 4  ;;  %v1445_v46 = vrot.slane %v1444_v45, 4 }
 0x4f0   : > { %v1438_v27 = vadd.f32 %v1437_v26, %v1436_v25  ;;  %v1446_v47 = vadd.f32 %v1445_v46, %v1444_v45 }
 0x4f2   : > { %v1439_v28 = vrot.slane %v1438_v27, 2  ;;  %v1447_v49 = vrot.slane %v1446_v47, 2 }
 0x4f4   : > { %v1440_v29 = vadd.f32 %v1439_v28, %v1438_v27  ;;  %v1448_v38 = vadd.f32 %v1447_v49, %v1446_v47 }
 0x4f6   : > { %v1441_v30 = vrot.slane %v1440_v29, 1  ;;  %v1449_v51 = vrot.slane %v1448_v38, 1 }
 0x4f8   : > { %v1442_v31 = vadd.f32 %v1441_v30, %v1440_v29  ;;  %v1450_v52 = vadd.f32 %v1449_v51, %v1448_v38 }
 0x4fa   : > { %v1452_v32 = vsel %vm1451_vm14, %v1442_v31, 0.0 }
 0x4fb   : > { %v1453_v33 = vsel %vm1395_vm11, %v1452_v32, 0.0 }
 0x4fc   : > { %1454 = vadd.xlane.f32.xlu0 %v1453_v33 }
 0x500   : > { %1462 = vadd.xlane.f32.xlu0 %v1461_v35 }
 0x54c   : > { %v3086_v36 = vpop.f32.mrb[12].mxu0 }
 0x54d   : > { %v2515_v37 = vpop.f32.mrb[13].mxu0 }
 0x550   : > { %v3088_v40 = vpop.f32.mrb[14].mxu0 }
 0x551   : > { %v2520_v43 = vpop.f32.mrb[15].mxu0 }
 0x589   : > { %v1455_v50 = vpop.xlane.xlu0 %1454 }
 0x58a   : > { %2624 = vrcp.f32 %v1455_v50 }
 0x58d   : > { %v1463_v53 = vpop.xlane.xlu0 %1462 }
 0x58e   : > { %v1464_v60 = vsel %vm1434_vm13, 0.0, %v1463_v53 }
 0x594   : > { %v2625_v54 = vpop.eup %2624 }
 0x595   : > { %v1458_v57 = vmul.f32 %v2625_v54, %v1442_v31  ;;  %v1459_v59 = vmul.f32 %v2625_v54, %v1450_v52 }
 0x597   : > { %v1465_v61 = vmul.f32 %v1464_v60, %v1458_v57  ;;  %v1470_v62 = vmul.f32 %v1464_v60, %v1459_v59 }
 0x599   : > { %v1466_v63 = vsub.f32 %v1430_v22, %v1465_v61  ;;  %v1471_v0 = vsub.f32 %v1433_v23, %v1470_v62 }
 0x59b   : > { %v1469_v1 = vsel %vm1434_vm13, %v1458_v57, %v1466_v63  ;;  %v1472_v3 = vsel %vm1434_vm13, %v1459_v59, %v1471_v0  ;;  %vm1685_vm13 = vcmp.eq.s32.totalorder %v3035_v42, 7 }
 0x59c   : > { %v1474_v4 = vsel %vm1473_vm15, %v1469_v1, 0.0  ;;  %v1499_v2 = vsel %vm1490_vm0, %v1469_v1, 0.0  ;;  %v1482_v12 = vsel %vm1473_vm15, %v1472_v3, 0.0 }
 0x59d   : > { %v1475_v5 = vsel %vm1395_vm11, %v1474_v4, 0.0  ;;  %v1500_v13 = vsel %vm1395_vm11, %v1499_v2, 0.0  ;;  %v1483_v14 = vsel %vm1404_vm12, %v1482_v12, 0.0 }
 0x59e   : > { %v1476_v48 = vrot.slane %v1475_v5, 4  ;;  %v1484_v15 = vrot.slane %v1483_v14, 4 }
 0x5a0   : > { %v1477_v55 = vadd.f32 %v1476_v48, %v1475_v5  ;;  %v1485_v16 = vadd.f32 %v1484_v15, %v1483_v14 }
 0x5a2   : > { %v1478_v7 = vrot.slane %v1477_v55, 2  ;;  %v1486_v17 = vrot.slane %v1485_v16, 2 }
 0x5a4   : > { %v1479_v8 = vadd.f32 %v1478_v7, %v1477_v55  ;;  %v1487_v19 = vadd.f32 %v1486_v17, %v1485_v16 }
 0x5a6   : > { %v1480_v9 = vrot.slane %v1479_v8, 1  ;;  %v1488_v20 = vrot.slane %v1487_v19, 1 }
 0x5a8   : > { %v1481_v58 = vadd.f32 %v1480_v9, %v1479_v8  ;;  %v1489_v21 = vadd.f32 %v1488_v20, %v1487_v19 }
 0x5aa   : > { %v1491_v10 = vsel %vm1490_vm0, %v1481_v58, 0.0 }
 0x5ab   : > { %v1492_v11 = vsel %vm1395_vm11, %v1491_v10, 0.0 }
 0x5ac   : > { %1493 = vadd.xlane.f32.xlu0 %v1492_v11 }
 0x5b0   : > { %1501 = vadd.xlane.f32.xlu0 %v1500_v13 }
 0x639   : > { %v1494_v18 = vpop.xlane.xlu0 %1493 }
 0x63a   : > { %2626 = vrcp.f32 %v1494_v18 }
 0x63d   : > { %v1502_v22 = vpop.xlane.xlu0 %1501 }
 0x63e   : > { %v1503_v26 = vsel %vm1473_vm15, 0.0, %v1502_v22 }
 0x644   : > { %v2627_v23 = vpop.eup %2626 }
 0x645   : > { %v1497_v24 = vmul.f32 %v2627_v23, %v1481_v58  ;;  %v1498_v25 = vmul.f32 %v2627_v23, %v1489_v21 }
 0x647   : > { %v1504_v27 = vmul.f32 %v1503_v26, %v1497_v24  ;;  %v1509_v28 = vmul.f32 %v1503_v26, %v1498_v25 }
 0x649   : > { %v1505_v29 = vsub.f32 %v1469_v1, %v1504_v27  ;;  %v1510_v30 = vsub.f32 %v1472_v3, %v1509_v28 }
 0x64b   : > { %v1508_v31 = vsel %vm1473_vm15, %v1497_v24, %v1505_v29  ;;  %v1511_v32 = vsel %vm1473_vm15, %v1498_v25, %v1510_v30 }
 0x64c   : > { %v1513_v33 = vsel %vm1512_vm1, %v1508_v31, 0.0  ;;  %v1538_v50 = vsel %vm1529_vm2, %v1508_v31, 0.0  ;;  %v1521_v51 = vsel %vm1512_vm1, %v1511_v32, 0.0 }
 0x64d   : > { %v1514_v34 = vsel %vm1395_vm11, %v1513_v33, 0.0  ;;  %v1539_v38 = vsel %vm1395_vm11, %v1538_v50, 0.0  ;;  %v1522_v52 = vsel %vm1404_vm12, %v1521_v51, 0.0 }
 0x64e   : > { %v1515_v35 = vrot.slane %v1514_v34, 4  ;;  %v1523_v53 = vrot.slane %v1522_v52, 4 }
 0x650   : > { %v1516_v37 = vadd.f32 %v1515_v35, %v1514_v34  ;;  %v1524_v54 = vadd.f32 %v1523_v53, %v1522_v52 }
 0x652   : > { %v1517_v43 = vrot.slane %v1516_v37, 2  ;;  %v1525_v57 = vrot.slane %v1524_v54, 2 }
 0x654   : > { %v1518_v44 = vadd.f32 %v1517_v43, %v1516_v37  ;;  %v1526_v60 = vadd.f32 %v1525_v57, %v1524_v54 }
 0x656   : > { %v1519_v45 = vrot.slane %v1518_v44, 1  ;;  %v1527_v61 = vrot.slane %v1526_v60, 1 }
 0x658   : > { %v1520_v46 = vadd.f32 %v1519_v45, %v1518_v44  ;;  %v1528_v62 = vadd.f32 %v1527_v61, %v1526_v60 }
 0x65a   : > { %v1530_v47 = vsel %vm1529_vm2, %v1520_v46, 0.0 }
 0x65b   : > { %v1531_v49 = vsel %vm1395_vm11, %v1530_v47, 0.0 }
 0x65c   : > { %1532 = vadd.xlane.f32.xlu0 %v1531_v49 }
 0x660   : > { %1540 = vadd.xlane.f32.xlu0 %v1539_v38 }
 0x6e9   : > { %v1533_v59 = vpop.xlane.xlu0 %1532 }
 0x6ea   : > { %2628 = vrcp.f32 %v1533_v59 }
 0x6ed   : > { %v1541_v63 = vpop.xlane.xlu0 %1540 }
 0x6ee   : > { %v1542_v4 = vsel %vm1512_vm1, 0.0, %v1541_v63 }
 0x6f4   : > { %v2629_v0 = vpop.eup %2628 }
 0x6f5   : > { %v1536_v1 = vmul.f32 %v2629_v0, %v1520_v46  ;;  %v1537_v3 = vmul.f32 %v2629_v0, %v1528_v62 }
 0x6f7   : > { %v1543_v5 = vmul.f32 %v1542_v4, %v1536_v1  ;;  %v1548_v48 = vmul.f32 %v1542_v4, %v1537_v3 }
 0x6f9   : > { %v1544_v55 = vsub.f32 %v1508_v31, %v1543_v5  ;;  %v1549_v7 = vsub.f32 %v1511_v32, %v1548_v48 }
 0x6fb   : > { %v1547_v8 = vsel %vm1512_vm1, %v1536_v1, %v1544_v55  ;;  %v1550_v9 = vsel %vm1512_vm1, %v1537_v3, %v1549_v7 }
 0x6fc   : > { %v1552_v58 = vsel %vm1551_vm3, %v1547_v8, 0.0  ;;  %v1577_v18 = vsel %vm1568_vm4, %v1547_v8, 0.0  ;;  %v1560_v20 = vsel %vm1551_vm3, %v1550_v9, 0.0 }
 0x6fd   : > { %v1553_v10 = vsel %vm1395_vm11, %v1552_v58, 0.0  ;;  %v1578_v19 = vsel %vm1395_vm11, %v1577_v18, 0.0  ;;  %v1561_v21 = vsel %vm1404_vm12, %v1560_v20, 0.0 }
 0x6fe   : > { %v1554_v11 = vrot.slane %v1553_v10, 4  ;;  %v1562_v22 = vrot.slane %v1561_v21, 4 }
 0x700   : > { %v1555_v2 = vadd.f32 %v1554_v11, %v1553_v10  ;;  %v1563_v23 = vadd.f32 %v1562_v22, %v1561_v21 }
 0x702   : > { %v1556_v13 = vrot.slane %v1555_v2, 2  ;;  %v1564_v24 = vrot.slane %v1563_v23, 2 }
 0x704   : > { %v1557_v12 = vadd.f32 %v1556_v13, %v1555_v2  ;;  %v1565_v26 = vadd.f32 %v1564_v24, %v1563_v23 }
 0x706   : > { %v1558_v14 = vrot.slane %v1557_v12, 1  ;;  %v1566_v27 = vrot.slane %v1565_v26, 1 }
 0x708   : > { %v1559_v15 = vadd.f32 %v1558_v14, %v1557_v12  ;;  %v1567_v28 = vadd.f32 %v1566_v27, %v1565_v26 }
 0x70a   : > { %v1569_v16 = vsel %vm1568_vm4, %v1559_v15, 0.0 }
 0x70b   : > { %v1570_v17 = vsel %vm1395_vm11, %v1569_v16, 0.0 }
 0x70c   : > { %1571 = vadd.xlane.f32.xlu0 %v1570_v17 }
 0x710   : > { %1579 = vadd.xlane.f32.xlu0 %v1578_v19 }
 0x799   : > { %v1572_v25 = vpop.xlane.xlu0 %1571 }
 0x79a   : > { %2630 = vrcp.f32 %v1572_v25 }
 0x79d   : > { %v1580_v29 = vpop.xlane.xlu0 %1579 }
 0x79e   : > { %v1581_v33 = vsel %vm1551_vm3, 0.0, %v1580_v29 }
 0x7a4   : > { %v2631_v30 = vpop.eup %2630 }
 0x7a5   : > { %v1575_v31 = vmul.f32 %v2631_v30, %v1559_v15  ;;  %v1576_v32 = vmul.f32 %v2631_v30, %v1567_v28 }
 0x7a7   : > { %v1582_v34 = vmul.f32 %v1581_v33, %v1575_v31  ;;  %v1587_v35 = vmul.f32 %v1581_v33, %v1576_v32 }
 0x7a9   : > { %v1583_v37 = vsub.f32 %v1547_v8, %v1582_v34  ;;  %v1588_v43 = vsub.f32 %v1550_v9, %v1587_v35 }
 0x7ab   : > { %v1589_v44 = vsel %vm1551_vm3, %v1576_v32, %v1588_v43  ;;  %v1586_v45 = vsel %vm1551_vm3, %v1575_v31, %v1583_v37 }
 0x7ac   : > { %v1616_v46 = vsel %vm1607_vm6, %v1586_v45, 0.0  ;;  %v1591_v47 = vsel %vm1590_vm5, %v1586_v45, 0.0  ;;  %v1599_v61 = vsel %vm1590_vm5, %v1589_v44, 0.0 }
 0x7ad   : > { %v1617_v49 = vsel %vm1395_vm11, %v1616_v46, 0.0  ;;  %v1592_v50 = vsel %vm1395_vm11, %v1591_v47, 0.0  ;;  %v1600_v62 = vsel %vm1404_vm12, %v1599_v61, 0.0 }
 0x7ae   : > { %1618 = vadd.xlane.f32.xlu0 %v1617_v49  ;;  %v1593_v38 = vrot.slane %v1592_v50, 4  ;;  %v1601_v63 = vrot.slane %v1600_v62, 4 }
 0x7b0   : > { %v1594_v51 = vadd.f32 %v1593_v38, %v1592_v50  ;;  %v1602_v0 = vadd.f32 %v1601_v63, %v1600_v62 }
 0x7b2   : > { %v1595_v52 = vrot.slane %v1594_v51, 2  ;;  %v1603_v1 = vrot.slane %v1602_v0, 2 }
 0x7b4   : > { %v1596_v53 = vadd.f32 %v1595_v52, %v1594_v51  ;;  %v1604_v4 = vadd.f32 %v1603_v1, %v1602_v0 }
 0x7b6   : > { %v1597_v54 = vrot.slane %v1596_v53, 1  ;;  %v1605_v5 = vrot.slane %v1604_v4, 1 }
 0x7b8   : > { %v1598_v57 = vadd.f32 %v1597_v54, %v1596_v53  ;;  %v1606_v55 = vadd.f32 %v1605_v5, %v1604_v4  ;;  %v1877_v4 = vmul.f32 %v3056_v6, %v3056_v6 }
 0x7ba   : > { %v1608_v59 = vsel %vm1607_vm6, %v1598_v57, 0.0  ;;  %v1879_v5 = vsel %vm892_vm7, %v1877_v4, 0.0  ;;  %vm2223_vm7 = vcmask 57344  }
 0x7bb   : > { %v1609_v60 = vsel %vm1395_vm11, %v1608_v59, 0.0 }
 0x7bc   : > { %1610 = vadd.xlane.f32.xlu1 %v1609_v60 }
 0x83b   : > { %v1619_v48 = vpop.xlane.xlu0 %1618 }
 0x83c   : > { %v1620_v58 = vsel %vm1590_vm5, 0.0, %v1619_v48  ;;  %v2118_v48 = vpop.f32.mrb[12].mxu1 }
 0x849   : > { %v1611_v3 = vpop.xlane.xlu1 %1610 }
 0x84a   : > { %2632 = vrcp.f32 %v1611_v3 }
 0x854   : > { %v2633_v7 = vpop.eup %2632 }
 0x855   : > { %v1615_v8 = vmul.f32 %v2633_v7, %v1606_v55  ;;  %v1614_v9 = vmul.f32 %v2633_v7, %v1598_v57  ;;  %v2525_v55 = vpop.f32.mrb[13].mxu1  ;;  %v2191_v7 = vpop.f32.mrb[16].mxu0 }
 0x857   : > { %v1626_v10 = vmul.f32 %v1620_v58, %v1615_v8  ;;  %v1621_v11 = vmul.f32 %v1620_v58, %v1614_v9 }
 0x859   : > { %v1627_v2 = vsub.f32 %v1589_v44, %v1626_v10  ;;  %v1622_v13 = vsub.f32 %v1586_v45, %v1621_v11  ;;  %v2198_v10 = vrot.slane %v2118_v48, %v2958_v41  ;;  %v2200_v11 = vmul.f32 2.0, %v2191_v7 }
 0x85b   : > { %v1628_v12 = vsel %vm1590_vm5, %v1615_v8, %v1627_v2  ;;  %v1625_v14 = vsel %vm1590_vm5, %v1614_v9, %v1622_v13  ;;  %v2530_v8 = vpop.f32.mrb[17].mxu0 }
 0x85c   : > { %v1655_v15 = vsel %vm1646_vm9, %v1625_v14, 0.0  ;;  %v1630_v16 = vsel %vm1629_vm8, %v1625_v14, 0.0  ;;  %v1638_v27 = vsel %vm1629_vm8, %v1628_v12, 0.0 }
 0x85d   : > { %v1656_v17 = vsel %vm1395_vm11, %v1655_v15, 0.0  ;;  %v1631_v18 = vsel %vm1395_vm11, %v1630_v16, 0.0  ;;  %v1639_v28 = vsel %vm1404_vm12, %v1638_v27, 0.0 }
 0x85e   : > { %1657 = vadd.xlane.f32.xlu0 %v1656_v17  ;;  %v1632_v19 = vrot.slane %v1631_v18, 4  ;;  %v1640_v29 = vrot.slane %v1639_v28, 4  ;;  %v2038_v17 = vrot.slane %v3086_v36, %v2958_v41 }
 0x860   : > { %v1633_v20 = vadd.f32 %v1632_v19, %v1631_v18  ;;  %v1641_v30 = vadd.f32 %v1640_v29, %v1639_v28 }
 0x862   : > { %v1634_v21 = vrot.slane %v1633_v20, 2  ;;  %v1642_v31 = vrot.slane %v1641_v30, 2 }
 0x864   : > { %v1635_v22 = vadd.f32 %v1634_v21, %v1633_v20  ;;  %v1643_v33 = vadd.f32 %v1642_v31, %v1641_v30  ;;  %v2040_v20 = vmul.f32 2.0, %v3088_v40 }
 0x866   : > { %v1636_v23 = vrot.slane %v1635_v22, 1  ;;  %v1644_v34 = vrot.slane %v1643_v33, 1 }
 0x868   : > { %v1637_v24 = vadd.f32 %v1636_v23, %v1635_v22  ;;  %v1645_v37 = vadd.f32 %v1644_v34, %v1643_v33 }
 0x86a   : > { %v1647_v25 = vsel %vm1646_vm9, %v1637_v24, 0.0 }
 0x86b   : > { %v1648_v26 = vsel %vm1395_vm11, %v1647_v25, 0.0 }
 0x86c   : > { %1649 = vadd.xlane.f32.xlu1 %v1648_v26 }
 0x8eb   : > { %v1658_v35 = vpop.xlane.xlu0 %1657 }
 0x8ec   : > { %v1659_v46 = vsel %vm1629_vm8, 0.0, %v1658_v35 }
 0x8f9   : > { %v1650_v32 = vpop.xlane.xlu1 %1649 }
 0x8fa   : > { %2634 = vrcp.f32 %v1650_v32 }
 0x904   : > { %v2635_v43 = vpop.eup %2634 }
 0x905   : > { %v1654_v44 = vmul.f32 %v2635_v43, %v1645_v37  ;;  %v1653_v45 = vmul.f32 %v2635_v43, %v1637_v24 }
 0x907   : > { %v1665_v47 = vmul.f32 %v1659_v46, %v1654_v44  ;;  %v1660_v49 = vmul.f32 %v1659_v46, %v1653_v45 }
 0x909   : > { %v1666_v50 = vsub.f32 %v1628_v12, %v1665_v47  ;;  %v1661_v38 = vsub.f32 %v1625_v14, %v1660_v49 }
 0x90b   : > { %v1664_v51 = vsel %vm1629_vm8, %v1653_v45, %v1661_v38  ;;  %v1667_v52 = vsel %vm1629_vm8, %v1654_v44, %v1666_v50 }
 0x90c   : > { %v1693_v53 = vsel %vm1685_vm13, %v1664_v51, 0.0  ;;  %v1669_v54 = vsel %vm1668_vm10, %v1664_v51, 0.0 }
 0x90d   : > { %v1694_v57 = vsel %vm1395_vm11, %v1693_v53, 0.0  ;;  %v1670_v59 = vsel %vm1395_vm11, %v1669_v54, 0.0 }
 0x90e   : > { %1695 = vadd.xlane.f32.xlu0 %v1694_v57  ;;  %v1671_v60 = vrot.slane %v1670_v59, 4 }
 0x910   : > { %v1672_v61 = vadd.f32 %v1671_v60, %v1670_v59 }
 0x912   : > { %v1673_v62 = vrot.slane %v1672_v61, 2  ;;  %2044 = vadd.xlane.f32.xlu0 %v2987_v56  ;;  %v1677_v56 = vsel %vm1668_vm10, %v1667_v52, 0.0 }
 0x913   : > { %v1678_v58 = vsel %vm1404_vm12, %v1677_v56, 0.0 }
 0x914   : > { %v1674_v42 = vadd.f32 %v1673_v62, %v1672_v61  ;;  %v1679_v2 = vrot.slane %v1678_v58, 4 }
 0x916   : > { %v1675_v63 = vrot.slane %v1674_v42, 1  ;;  %v1680_v14 = vadd.f32 %v1679_v2, %v1678_v58 }
 0x918   : > { %v1676_v0 = vadd.f32 %v1675_v63, %v1674_v42  ;;  %v1681_v15 = vrot.slane %v1680_v14, 2 }
 0x91a   : > { %v1686_v1 = vsel %vm1685_vm13, %v1676_v0, 0.0  ;;  %v1682_v18 = vadd.f32 %v1681_v15, %v1680_v14 }
 0x91b   : > { %v1687_v3 = vsel %vm1395_vm11, %v1686_v1, 0.0 }
 0x91c   : > { %1688 = vadd.xlane.f32.xlu1 %v1687_v3  ;;  %v1683_v22 = vrot.slane %v1682_v18, 1 }
 0x91e   : > { %v1684_v25 = vadd.f32 %v1683_v22, %v1682_v18 }
 0x920   : > { %1880 = vadd.xlane.f32.xlu1 %v1879_v5 }
 0x99b   : > { %v1696_v9 = vpop.xlane.xlu0 %1695 }
 0x99c   : > { %v1697_v28 = vsel %vm1668_vm10, 0.0, %v1696_v9 }
 0x99f   : > { %v2045_v13 = vpop.xlane.xlu0 %2044 }
 0x9a0   : > { %v2199_v6 = vadd.f32 %v2198_v10, %v2045_v13 }
 0x9a2   : > { %v2201_v12 = vsub.f32 %v2199_v6, %v2200_v11 }
 0x9a9   : > { %v1689_v16 = vpop.xlane.xlu1 %1688 }
 0x9aa   : > { %2636 = vrcp.f32 %v1689_v16 }
 0x9ad   : > { %v1881_v19 = vpop.xlane.xlu1 %1880 }
 0x9ae   : > { %v2039_v21 = vadd.f32 %v2038_v17, %v1881_v19 }
 0x9b0   : > { %v2041_v23 = vsub.f32 %v2039_v21, %v2040_v20 }
 0x9b2   : > { %v2202_v24 = vadd.f32 %v2201_v12, %v2041_v23 }
 0x9b4   : > { %v2637_v26 = vpop.eup %2636  ;;  %v2203_v40 = vmax.f32 %v2202_v24, 0.0 }
 0x9b5   : > { %v1692_v27 = vmul.f32 %v2637_v26, %v1684_v25 }
 0x9b6   : > { %v2204_v31 = vsub.f32 0.0, %v2203_v40 }
 0x9b7   : > { %v1698_v29 = vmul.f32 %v1697_v28, %v1692_v27 }
 0x9b8   : > { %v2205_v32 = vmul.f32 2.0, %v2204_v31 }
 0x9b9   : > { %v1699_v30 = vsub.f32 %v1667_v52, %v1698_v29 }
 0x9ba   : > { %v2206_v33 = vmul.f32 1.442695, %v2205_v32 }
 0x9bb   : > { %v1700_v41 = vsel %vm1668_vm10, %v1692_v27, %v1699_v30 }
 0x9bc   : > { %1701 = vst.msk [vmem:[#allocation4] sm:$0xff] %vm1404_vm12, %v1700_v41  ;;  %2638 = vpow2.f32 %v2206_v33 }
 0x9c3   : > { %v2208_v36 = vld [vmem:[#allocation4] sm:$0xff] }
 0x9c4   : > { %2211 = vperm.xlu1 %2612, %v2208_v36  }
 0x9c6   : > { %v2639_v34 = vpop.eup %2638 }
 0xa43   : > { %v2212_v35 = vpop.permute.xlu1 %2211 }
 0xa44   : > { %v2214_v37 = vmul.f32 %v2639_v34, %v2212_v35 }
 0xa46   : > { %v2216_v43 = vsel %vm1395_vm11, %v2214_v37, 0.0 }
 0xa47   : > { %v2217_v44 = vrot.slane %v2216_v43, 4 }
 0xa49   : > { %v2218_v39 = vadd.f32 %v2217_v44, %v2216_v43 }
 0xa4b   : > { %v2219_v45 = vrot.slane %v2218_v39, 2 }
 0xa4d   : > { %v2220_v46 = vadd.f32 %v2219_v45, %v2218_v39 }
 0xa4f   : > { %v2221_v47 = vrot.slane %v2220_v46, 1 }
 0xa51   : > { %v2222_v49 = vadd.f32 %v2221_v47, %v2220_v46 }
 0xa53   : > { %2224 = vst.msk [vmem:[%s520_s0] sm:$0x1] %vm2223_vm7, %v2222_v49 }
 0xa54   : > { %2653 = shalt.err (!%p2650_p5)
}
 0xa55   : > { %s2654_s13 = scalar_lea.hbm %s3208_s22, 16  ;;  %s2658_s25 = scalar_lea.hbm %s3269_s14, 32 }
 0xa56   : > { %p2655_p6 = scmp.ne.s32.totalorder %s3208_s22, %s2654_s13  ;;  %p2659_p10 = scmp.lt.u32.totalorder %s3208_s22, %s3269_s14 }
 0xa57   : > { %p2660_p11 = scmp.lt.u32.totalorder %s2658_s25, %s2654_s13  ;;  %p2662_p13 = scmp.lt.u32.totalorder %s2654_s13, %s3208_s22 }
 0xa58   : > { %p2656_p7 = pnand %p2655_p6, %p2844_p4 }
 0xa59   : > { %p2661_p12 = por %p2660_p11, %p2659_p10 }
 0xa5a   : > { %p2657_p9 = pneg %p2656_p7 }
 0xa5b   : > { %p2663_p0 = por %p2662_p13, %p2661_p12 }
 0xa5d   : > { %p2664_p1 = pnand %p2663_p0, %p2657_p9 }
 0xa5f   : > { %2667 = shalt.err (!%p2664_p1)
}
 0xa60   : > { %2552 = dma.vmem_to_hbm [thread:$0]  (%p2844_p4), %s3210_s23, 16, %s3208_s22, %s2226_s28  }
 0xa61 PF: > { %p2558_p2 = scmp.ge.s32.totalorder %s2718_s20, 2  ;;  %s2251_s1 = sand.u32 1, %s2698_s15  }
 0xa62   : > { %s2252_s29 = scalar_lea.sflag [#allocation7], %s2251_s1 }
 0xa63   : > { %p2555_p3 = pnand %p2558_p2, %p2851_p8 }
 0xa65   : > { %2693 = dma.done.wait (!%p2555_p3), %s2252_s29, 16  }
 0xa66   : > { %2695 = vsyncadd (!%p2555_p3), %s2252_s29, 4294967280  ;;  %s29_s20 = sadd.s32 1, %s2718_s20   ;;  %s3280_s24 = sld [smem:[#allocation9_spill]] }
 0xa67   : > { %p26_p5 = scmp.ge.s32.totalorder %s29_s20, 4   ;;  %s3281_s15 = smov %s2702_s16 }
 0xa68   : > { %s3282_s16 = smov %s2706_s17  ;;  %s3283_s17 = smov %s2857_s27 }
 0xa69   : > { %s3284_s18 = smov %s2714_s19  ;;  %28 = sbr.rel (!%p26_p5) target bundleno = 8 (0x8), region = 124 }
 0xa6c   : > { %s3285_s19 = smov %s3280_s24 }
 0xa70   :  { %2256 = vsyncpa [#allocation7], 1 }
 0xa71   :  { %2258 = vsyncpa [#allocation7 + $0x1], 1 }

</bundles_post_ra>
